<compile_context>
chip_gen: v7x
topology: tpu7x:2x2x1
jax: 0.10.0
libtpu: 0.0.40
codegen_flags: <defaults>
</compile_context>

<pallas_src>
import jax
import jax.numpy as jnp
from jax import lax
from jax.experimental import pallas as pl
from jax.experimental.pallas import tpu as pltpu


def _decoder_kernel(x_ref, bt_ref, wm_ref, b_ref, o_ref, xbp_ref):
    # x_ref:   (1, H*Cin, W)       bf16 input, rows ordered (p, c)  (row-major over H then Cin)
    # bt_ref:  (3, W, 2W)          bf16 0/1 column upsample+tap matrices, one per dw
    # wm_ref:  (2*Cout, 3*KS)      bf16 merged conv weights; K index = dr*KS + dw*Cin + c
    # b_ref:   (2*Cout, 1)         f32 bias (duplicated for the even/odd halves)
    # o_ref:   (1, Cout, 2*CH*2W)  output block for this (batch, chunk): rows [2*p0, 2*p0+2*CH)
    # xbp_ref: (H+2, KS, 2W)       bf16 scratch: plane p+1 holds column-tapped row p; planes 0, H+1 = 0
    t = pl.program_id(1)

    Cout = o_ref.shape[1]
    H = xbp_ref.shape[0] - 2
    KS = xbp_ref.shape[1]
    W2 = xbp_ref.shape[2]
    Cin = x_ref.shape[1] // H
    CH = o_ref.shape[2] // (2 * W2)

    # ---- Stage A (once per image, at t == 0): column taps + x2 nearest upsample along W, on the MXU.
    #      xbp[p+1, dw*Cin + c, j] = x[p, c, (j + dw - 1) // 2]   (0 where that column is padding)
    @pl.when(t == 0)
    def _stage_a():
        x2 = x_ref[0]                                                      # (H*Cin, W) bf16
        slabs = [
            jnp.dot(x2, bt_ref[dw], preferred_element_type=jnp.float32)    # (H*Cin, 2W)
            .reshape(H, Cin, W2)
            for dw in range(3)
        ]
        if KS > 3 * Cin:
            slabs.append(jnp.zeros((H, KS - 3 * Cin, W2), jnp.float32))
        xbp_ref[1:H + 1, :, :] = jnp.concatenate(slabs, axis=1).astype(xbp_ref.dtype)
        zero_plane = jnp.zeros((KS, W2), xbp_ref.dtype)
        xbp_ref[0, :, :] = zero_plane                                      # row padding (top)
        xbp_ref[H + 1, :, :] = zero_plane                                  # row padding (bottom)

    # ---- Stage B: one merged MXU dot per input row produces both output rows of the pair.
    wm = wm_ref[...]                                                       # (2*Cout, 3*KS) bf16
    bias = jnp.broadcast_to(b_ref[...], (2 * Cout, W2))                    # hoisted out of the loop
    p0 = t * CH
    for i in range(CH):                                                    # short fixed unroll (CH <= 8)
        slab = xbp_ref[pl.ds(p0 + i, 3)]                                   # (3, KS, 2W): x rows p-1, p, p+1
        slab = slab.reshape(3 * KS, W2)                                    # free view (KS % 16 == 0)
        r = jnp.dot(wm, slab, preferred_element_type=jnp.float32) + bias   # (2*Cout, 2W) f32
        r = jnp.maximum(r, 0.0).astype(o_ref.dtype)
        o_ref[0, :, (2 * i) * W2:(2 * i + 1) * W2] = r[:Cout]              # output row 2*(p0+i)
        o_ref[0, :, (2 * i + 1) * W2:(2 * i + 2) * W2] = r[Cout:]          # output row 2*(p0+i)+1


def _column_tap_matrices(W):
    # Bt[dw, q, j] = 1  iff  0 <= j+dw-1 < 2W  and  (j+dw-1)//2 == q    (exact in bf16: 0/1 entries)
    j = jnp.arange(2 * W)
    q = jnp.arange(W)
    mats = []
    for dw in range(3):
        col = j + dw - 1
        valid = (col >= 0) & (col < 2 * W)
        src = jnp.clip(col, 0, 2 * W - 1) // 2
        mats.append(((src[None, :] == q[:, None]) & valid[None, :]).astype(jnp.float32))
    return jnp.stack(mats)  # (3, W, 2W)


def _fold_weights(w_oihw, ks):
    # (Cout, Cin, 3, 3) -> (2*Cout, 3*ks) merged matrix; K index = dr*ks + dw*Cin + c.
    # Rows [0:Cout] produce even output rows (2p), rows [Cout:2Cout] odd output rows (2p+1):
    #   even:  dr=0 (x row p-1) <- w[:,:,0,:]          dr=1 (x row p)   <- w[:,:,1,:] + w[:,:,2,:]
    #   odd :  dr=1 (x row p)   <- w[:,:,0,:]+w[:,:,1,:]  dr=2 (x row p+1) <- w[:,:,2,:]
    Cout, Cin = w_oihw.shape[0], w_oihw.shape[1]
    w0, w1, w2 = w_oihw[:, :, 0, :], w_oihw[:, :, 1, :], w_oihw[:, :, 2, :]  # (Cout, Cin, 3[dw])

    def fold(wdh):  # (Cout, Cin, 3[dw]) -> (Cout, ks), index dw*Cin + c, zero-padded
        m = jnp.transpose(wdh, (0, 2, 1)).reshape(Cout, 3 * Cin)
        return jnp.pad(m, ((0, 0), (0, ks - 3 * Cin)))

    z = jnp.zeros((Cout, ks), w_oihw.dtype)
    even = jnp.concatenate([fold(w0), fold(w1 + w2), z], axis=1)
    odd = jnp.concatenate([z, fold(w0 + w1), fold(w2)], axis=1)
    return jnp.concatenate([even, odd], axis=0)  # (2*Cout, 3*ks)


@jax.jit
def unet_decoder_block(x_nchw, w_oihw, b):
    """UnetDecoderBlock forward: Upsample(x2, nearest) -> Conv2d(3x3, pad=1) -> ReLU.

    x_nchw: (N, Cin, H, W), w_oihw: (Cout, Cin, 3, 3), b: (Cout,)  ->  (N, Cout, 2H, 2W)
    """
    N, Cin, H, W = x_nchw.shape
    Cout = w_oihw.shape[0]
    H2, W2 = 2 * H, 2 * W
    CH = 8 if H % 8 == 0 else H               # input rows per grid step (short fixed unroll)
    T = H // CH
    KS = ((3 * Cin + 15) // 16) * 16          # pad K-sublanes to bf16-tile multiple -> free slab view

    # Layout prep over the LOW-resolution input only (one fused XLA pass, small vs the 4x output):
    # (N, Cin, H, W) -> (N, H, Cin, W) so Stage A's matmul rows come out (p, c)-major, matching the
    # scratch's (row-plane, channel-sublane) layout; cast MXU operands to bf16.
    x_rows = jnp.transpose(x_nchw, (0, 2, 1, 3)).reshape(N, H * Cin, W).astype(jnp.bfloat16)
    bt = _column_tap_matrices(W).astype(jnp.bfloat16)
    wm = _fold_weights(w_oihw, KS).astype(jnp.bfloat16)
    b2 = jnp.concatenate([b, b]).reshape(2 * Cout, 1).astype(jnp.float32)

    flops = int(N * (3 * 2 * (H * Cin) * W * W2            # Stage A (taps + W-upsample on MXU)
                     + H * 2 * (2 * Cout) * (3 * KS) * W2))  # Stage B (merged per-row conv dot)
    bytes_accessed = int(x_rows.size * 2 + bt.size * 2 + wm.size * 2 + b2.size * 4
                         + N * Cout * H2 * W2 * 4)

    out_flat = pl.pallas_call(
        _decoder_kernel,
        out_shape=jax.ShapeDtypeStruct((N, Cout, H2 * W2), x_nchw.dtype),
        grid=(N, T),
        in_specs=[
            pl.BlockSpec((1, H * Cin, W), lambda n, t: (n, 0, 0)),
            pl.BlockSpec((3, W, W2), lambda n, t: (0, 0, 0)),
            pl.BlockSpec((2 * Cout, 3 * KS), lambda n, t: (0, 0)),
            pl.BlockSpec((2 * Cout, 1), lambda n, t: (0, 0)),
        ],
        out_specs=pl.BlockSpec((1, Cout, 2 * CH * W2), lambda n, t: (n, 0, t)),
        scratch_shapes=[pltpu.VMEM((H + 2, KS, W2), jnp.bfloat16)],
        compiler_params=pltpu.CompilerParams(
            dimension_semantics=("parallel", "arbitrary"),
            vmem_limit_bytes=64 * 1024 * 1024),
        cost_estimate=pl.CostEstimate(flops=flops, transcendentals=0,
                                      bytes_accessed=bytes_accessed),
    )(x_rows, bt, wm, b2)

    return out_flat.reshape(N, Cout, H2, W2)  # metadata-only reshape


def _reference(x_nchw, w_oihw, b):
    # Pure-JAX reference on the same bf16-quantized operands the kernel uses (f32 accumulation).
    xq = x_nchw.astype(jnp.bfloat16).astype(jnp.float32)
    wq = w_oihw.astype(jnp.bfloat16).astype(jnp.float32)
    xu = jnp.repeat(jnp.repeat(xq, 2, axis=2), 2, axis=3)
    y = lax.conv_general_dilated(
        xu, wq, window_strides=(1, 1), padding=((1, 1), (1, 1)),
        dimension_numbers=("NCHW", "OIHW", "NCHW"))
    y = y + b.reshape(1, -1, 1, 1)
    return jnp.maximum(y, 0.0)


if __name__ == "__main__":
    key = jax.random.PRNGKey(0)
    kx, kw, kb = jax.random.split(key, 3)

    # UnetDecoderBlock(in_channels=4, middle_channels=8, out_channels=8) at small spatial size.
    N, Cin, H, W = 2, 4, 16, 16
    Cout = 8

    x = jax.random.normal(kx, (N, Cin, H, W), dtype=jnp.float32)
    fan_in = Cin * 3 * 3
    bound = 1.0 / (fan_in ** 0.5)
    w = jax.random.uniform(kw, (Cout, Cin, 3, 3), jnp.float32, -bound, bound)
    b = jax.random.uniform(kb, (Cout,), jnp.float32, -bound, bound)

    out = jax.block_until_ready(unet_decoder_block(x, w, b))
    ref = jax.block_until_ready(_reference(x, w, b))

    assert out.shape == (N, Cout, 2 * H, 2 * W), out.shape
    # bf16 MXU operands with f32 accumulation: compare against the bf16-quantized reference.
    err = float(jnp.max(jnp.abs(out - ref)))
    assert jnp.allclose(out, ref, atol=2e-2, rtol=2e-2), f"mismatch vs reference (max abs err {err})"

    print("KERNEL_OK")
</pallas_src>

<mosaic_0001>
module attributes {stable_mosaic.version = 11 : i64} {
  func.func @_decoder_kernel(%arg0: i32, %arg1: i32, %arg2: memref<1x64x16xbf16, #tpu.memory_space<vmem>>, %arg3: memref<3x16x32xbf16, #tpu.memory_space<vmem>>, %arg4: memref<16x48xbf16, #tpu.memory_space<vmem>>, %arg5: memref<16x1xf32, #tpu.memory_space<vmem>>, %arg6: memref<1x8x512xf32, #tpu.memory_space<vmem>>, %arg7: memref<18x16x32xbf16, #tpu.memory_space<vmem>>) attributes {dimension_semantics = [#tpu.dimension_semantics<parallel>, #tpu.dimension_semantics<arbitrary>], iteration_bounds = array<i64: 2, 2>, scalar_prefetch = 0 : i64, scratch_operands = 1 : i64, tpu.core_type = #tpu.core_type<tc>, window_params = [{transform_indices = @transform_0, window_bounds = array<i64: 1, 64, 16>}, {pipeline_mode = #tpu.pipeline_mode<synchronous>, transform_indices = @transform_1, window_bounds = array<i64: 3, 16, 32>}, {pipeline_mode = #tpu.pipeline_mode<synchronous>, transform_indices = @transform_2, window_bounds = array<i64: 16, 48>}, {pipeline_mode = #tpu.pipeline_mode<synchronous>, transform_indices = @transform_3, window_bounds = array<i64: 16, 1>}, {transform_indices = @transform_4, window_bounds = array<i64: 1, 8, 512>}]} {
    %c0_i32 = arith.constant 0 : i32
    %0 = arith.cmpi eq, %arg1, %c0_i32 : i32
    %1 = arith.extui %0 : i1 to i32
    %c0_i32_0 = arith.constant 0 : i32
    %2 = arith.cmpi ne, %1, %c0_i32_0 : i32
    scf.if %2 {
      %c0_69 = arith.constant 0 : index
      %c0_70 = arith.constant 0 : index
      %c0_71 = arith.constant 0 : index
      %136 = vector.load %arg2[%c0_69, %c0_70, %c0_71] : memref<1x64x16xbf16, #tpu.memory_space<vmem>>, vector<1x64x16xbf16>
      %137 = vector.shape_cast %136 : vector<1x64x16xbf16> to vector<64x16xbf16>
      %c0_72 = arith.constant 0 : index
      %c0_73 = arith.constant 0 : index
      %c0_74 = arith.constant 0 : index
      %138 = vector.load %arg3[%c0_72, %c0_73, %c0_74] : memref<3x16x32xbf16, #tpu.memory_space<vmem>>, vector<1x16x32xbf16>
      %139 = vector.shape_cast %138 : vector<1x16x32xbf16> to vector<16x32xbf16>
      %cst_75 = arith.constant dense<0.000000e+00> : vector<64x32xf32>
      %140 = tpu.matmul %137, %139, %cst_75 {dimension_numbers = #tpu.dot_dimension_numbers<[1], [0], [0], [1], [0, 0, 1, 1], [], []>} : vector<64x16xbf16>, vector<16x32xbf16>, vector<64x32xf32> -> vector<64x32xf32>
      %141 = vector.shape_cast %140 : vector<64x32xf32> to vector<16x4x32xf32>
      %c1 = arith.constant 1 : index
      %c0_76 = arith.constant 0 : index
      %c0_77 = arith.constant 0 : index
      %142 = vector.load %arg3[%c1, %c0_76, %c0_77] : memref<3x16x32xbf16, #tpu.memory_space<vmem>>, vector<1x16x32xbf16>
      %143 = vector.shape_cast %142 : vector<1x16x32xbf16> to vector<16x32xbf16>
      %cst_78 = arith.constant dense<0.000000e+00> : vector<64x32xf32>
      %144 = tpu.matmul %137, %143, %cst_78 {dimension_numbers = #tpu.dot_dimension_numbers<[1], [0], [0], [1], [0, 0, 1, 1], [], []>} : vector<64x16xbf16>, vector<16x32xbf16>, vector<64x32xf32> -> vector<64x32xf32>
      %145 = vector.shape_cast %144 : vector<64x32xf32> to vector<16x4x32xf32>
      %c2 = arith.constant 2 : index
      %c0_79 = arith.constant 0 : index
      %c0_80 = arith.constant 0 : index
      %146 = vector.load %arg3[%c2, %c0_79, %c0_80] : memref<3x16x32xbf16, #tpu.memory_space<vmem>>, vector<1x16x32xbf16>
      %147 = vector.shape_cast %146 : vector<1x16x32xbf16> to vector<16x32xbf16>
      %cst_81 = arith.constant dense<0.000000e+00> : vector<64x32xf32>
      %148 = tpu.matmul %137, %147, %cst_81 {dimension_numbers = #tpu.dot_dimension_numbers<[1], [0], [0], [1], [0, 0, 1, 1], [], []>} : vector<64x16xbf16>, vector<16x32xbf16>, vector<64x32xf32> -> vector<64x32xf32>
      %149 = vector.shape_cast %148 : vector<64x32xf32> to vector<16x4x32xf32>
      %cst_82 = arith.constant 0.000000e+00 : f32
      %150 = vector.broadcast %cst_82 : f32 to vector<16x4x32xf32>
      %151 = tpu.concatenate %141, %145, %149, %150 in 1 : vector<16x4x32xf32>, vector<16x4x32xf32>, vector<16x4x32xf32>, vector<16x4x32xf32> -> vector<16x16x32xf32>
      %152 = arith.truncf %151 : vector<16x16x32xf32> to vector<16x16x32xbf16>
      %c1_83 = arith.constant 1 : index
      %c0_84 = arith.constant 0 : index
      %c0_85 = arith.constant 0 : index
      %153 = vector.load %arg7[%c1_83, %c0_84, %c0_85] : memref<18x16x32xbf16, #tpu.memory_space<vmem>>, vector<16x16x32xbf16>
      tpu.vector_store %arg7[%c1_83, %c0_84, %c0_85], %152 {strides = array<i32>} : memref<18x16x32xbf16, #tpu.memory_space<vmem>>, vector<16x16x32xbf16>,
      %cst_86 = arith.constant 0.000000e+00 : bf16
      %154 = vector.broadcast %cst_86 : bf16 to vector<16x32xbf16>
      %c0_87 = arith.constant 0 : index
      %c0_88 = arith.constant 0 : index
      %c0_89 = arith.constant 0 : index
      %155 = vector.load %arg7[%c0_87, %c0_88, %c0_89] : memref<18x16x32xbf16, #tpu.memory_space<vmem>>, vector<1x16x32xbf16>
      %156 = vector.shape_cast %155 : vector<1x16x32xbf16> to vector<16x32xbf16>
      %157 = vector.shape_cast %154 : vector<16x32xbf16> to vector<1x16x32xbf16>
      tpu.vector_store %arg7[%c0_87, %c0_88, %c0_89], %157 {strides = array<i32>} : memref<18x16x32xbf16, #tpu.memory_space<vmem>>, vector<1x16x32xbf16>,
      %c17 = arith.constant 17 : index
      %c0_90 = arith.constant 0 : index
      %c0_91 = arith.constant 0 : index
      %158 = vector.load %arg7[%c17, %c0_90, %c0_91] : memref<18x16x32xbf16, #tpu.memory_space<vmem>>, vector<1x16x32xbf16>
      %159 = vector.shape_cast %158 : vector<1x16x32xbf16> to vector<16x32xbf16>
      %160 = vector.shape_cast %154 : vector<16x32xbf16> to vector<1x16x32xbf16>
      tpu.vector_store %arg7[%c17, %c0_90, %c0_91], %160 {strides = array<i32>} : memref<18x16x32xbf16, #tpu.memory_space<vmem>>, vector<1x16x32xbf16>,
    } else {
    }
    %c0 = arith.constant 0 : index
    %c0_1 = arith.constant 0 : index
    %3 = vector.load %arg4[%c0, %c0_1] : memref<16x48xbf16, #tpu.memory_space<vmem>>, vector<16x48xbf16>
    %c0_2 = arith.constant 0 : index
    %c0_3 = arith.constant 0 : index
    %4 = vector.load %arg5[%c0_2, %c0_3] : memref<16x1xf32, #tpu.memory_space<vmem>>, vector<16x1xf32>
    %5 = vector.shape_cast %4 : vector<16x1xf32> to vector<16x1xf32>
    %6 = vector.broadcast %5 : vector<16x1xf32> to vector<16x32xf32>
    %c8_i32 = arith.constant 8 : i32
    %7 = arith.muli %arg1, %c8_i32 : i32
    %c0_i32_4 = arith.constant 0 : i32
    %8 = arith.addi %7, %c0_i32_4 : i32
    %9 = arith.index_cast %8 : i32 to index
    %c0_5 = arith.constant 0 : index
    %c0_6 = arith.constant 0 : index
    %10 = vector.load %arg7[%9, %c0_5, %c0_6] : memref<18x16x32xbf16, #tpu.memory_space<vmem>>, vector<3x16x32xbf16>
    %11 = vector.shape_cast %10 : vector<3x16x32xbf16> to vector<48x32xbf16>
    %cst = arith.constant dense<0.000000e+00> : vector<16x32xf32>
    %12 = tpu.matmul %3, %11, %cst {dimension_numbers = #tpu.dot_dimension_numbers<[1], [0], [0], [1], [0, 0, 1, 1], [], []>} : vector<16x48xbf16>, vector<48x32xbf16>, vector<16x32xf32> -> vector<16x32xf32>
    %13 = arith.addf %12, %6 : vector<16x32xf32>
    %cst_7 = arith.constant 0.000000e+00 : f32
    %14 = vector.broadcast %cst_7 : f32 to vector<16x32xf32>
    %15 = arith.maximumf %13, %14 : vector<16x32xf32>
    %16 = vector.extract_strided_slice %15 {offsets = [0, 0], sizes = [8, 32], strides = [1, 1]} : vector<16x32xf32> to vector<8x32xf32>
    %c0_8 = arith.constant 0 : index
    %c0_9 = arith.constant 0 : index
    %c0_10 = arith.constant 0 : index
    %17 = vector.load %arg6[%c0_8, %c0_9, %c0_10] : memref<1x8x512xf32, #tpu.memory_space<vmem>>, vector<1x8x32xf32>
    %18 = vector.shape_cast %17 : vector<1x8x32xf32> to vector<8x32xf32>
    %19 = vector.shape_cast %16 : vector<8x32xf32> to vector<1x8x32xf32>
    tpu.vector_store %arg6[%c0_8, %c0_9, %c0_10], %19 {strides = array<i32>} : memref<1x8x512xf32, #tpu.memory_space<vmem>>, vector<1x8x32xf32>,
    %20 = vector.extract_strided_slice %15 {offsets = [8, 0], sizes = [8, 32], strides = [1, 1]} : vector<16x32xf32> to vector<8x32xf32>
    %c0_11 = arith.constant 0 : index
    %c0_12 = arith.constant 0 : index
    %c32 = arith.constant 32 : index
    %21 = vector.load %arg6[%c0_11, %c0_12, %c32] : memref<1x8x512xf32, #tpu.memory_space<vmem>>, vector<1x8x32xf32>
    %22 = vector.shape_cast %21 : vector<1x8x32xf32> to vector<8x32xf32>
    %23 = vector.shape_cast %20 : vector<8x32xf32> to vector<1x8x32xf32>
    tpu.vector_store %arg6[%c0_11, %c0_12, %c32], %23 {strides = array<i32>} : memref<1x8x512xf32, #tpu.memory_space<vmem>>, vector<1x8x32xf32>,
    %c1_i32 = arith.constant 1 : i32
    %24 = arith.addi %7, %c1_i32 : i32
    %25 = arith.index_cast %24 : i32 to index
    %c0_13 = arith.constant 0 : index
    %c0_14 = arith.constant 0 : index
    %26 = vector.load %arg7[%25, %c0_13, %c0_14] : memref<18x16x32xbf16, #tpu.memory_space<vmem>>, vector<3x16x32xbf16>
    %27 = vector.shape_cast %26 : vector<3x16x32xbf16> to vector<48x32xbf16>
    %cst_15 = arith.constant dense<0.000000e+00> : vector<16x32xf32>
    %28 = tpu.matmul %3, %27, %cst_15 {dimension_numbers = #tpu.dot_dimension_numbers<[1], [0], [0], [1], [0, 0, 1, 1], [], []>} : vector<16x48xbf16>, vector<48x32xbf16>, vector<16x32xf32> -> vector<16x32xf32>
    %29 = arith.addf %28, %6 : vector<16x32xf32>
    %cst_16 = arith.constant 0.000000e+00 : f32
    %30 = vector.broadcast %cst_16 : f32 to vector<16x32xf32>
    %31 = arith.maximumf %29, %30 : vector<16x32xf32>
    %32 = vector.extract_strided_slice %31 {offsets = [0, 0], sizes = [8, 32], strides = [1, 1]} : vector<16x32xf32> to vector<8x32xf32>
    %c0_17 = arith.constant 0 : index
    %c0_18 = arith.constant 0 : index
    %c64 = arith.constant 64 : index
    %33 = vector.load %arg6[%c0_17, %c0_18, %c64] : memref<1x8x512xf32, #tpu.memory_space<vmem>>, vector<1x8x32xf32>
    %34 = vector.shape_cast %33 : vector<1x8x32xf32> to vector<8x32xf32>
    %35 = vector.shape_cast %32 : vector<8x32xf32> to vector<1x8x32xf32>
    tpu.vector_store %arg6[%c0_17, %c0_18, %c64], %35 {strides = array<i32>} : memref<1x8x512xf32, #tpu.memory_space<vmem>>, vector<1x8x32xf32>,
    %36 = vector.extract_strided_slice %31 {offsets = [8, 0], sizes = [8, 32], strides = [1, 1]} : vector<16x32xf32> to vector<8x32xf32>
    %c0_19 = arith.constant 0 : index
    %c0_20 = arith.constant 0 : index
    %c96 = arith.constant 96 : index
    %37 = vector.load %arg6[%c0_19, %c0_20, %c96] : memref<1x8x512xf32, #tpu.memory_space<vmem>>, vector<1x8x32xf32>
    %38 = vector.shape_cast %37 : vector<1x8x32xf32> to vector<8x32xf32>
    %39 = vector.shape_cast %36 : vector<8x32xf32> to vector<1x8x32xf32>
    tpu.vector_store %arg6[%c0_19, %c0_20, %c96], %39 {strides = array<i32>} : memref<1x8x512xf32, #tpu.memory_space<vmem>>, vector<1x8x32xf32>,
    %c2_i32 = arith.constant 2 : i32
    %40 = arith.addi %7, %c2_i32 : i32
    %41 = arith.index_cast %40 : i32 to index
    %c0_21 = arith.constant 0 : index
    %c0_22 = arith.constant 0 : index
    %42 = vector.load %arg7[%41, %c0_21, %c0_22] : memref<18x16x32xbf16, #tpu.memory_space<vmem>>, vector<3x16x32xbf16>
    %43 = vector.shape_cast %42 : vector<3x16x32xbf16> to vector<48x32xbf16>
    %cst_23 = arith.constant dense<0.000000e+00> : vector<16x32xf32>
    %44 = tpu.matmul %3, %43, %cst_23 {dimension_numbers = #tpu.dot_dimension_numbers<[1], [0], [0], [1], [0, 0, 1, 1], [], []>} : vector<16x48xbf16>, vector<48x32xbf16>, vector<16x32xf32> -> vector<16x32xf32>
    %45 = arith.addf %44, %6 : vector<16x32xf32>
    %cst_24 = arith.constant 0.000000e+00 : f32
    %46 = vector.broadcast %cst_24 : f32 to vector<16x32xf32>
    %47 = arith.maximumf %45, %46 : vector<16x32xf32>
    %48 = vector.extract_strided_slice %47 {offsets = [0, 0], sizes = [8, 32], strides = [1, 1]} : vector<16x32xf32> to vector<8x32xf32>
    %c0_25 = arith.constant 0 : index
    %c0_26 = arith.constant 0 : index
    %c128 = arith.constant 128 : index
    %49 = vector.load %arg6[%c0_25, %c0_26, %c128] : memref<1x8x512xf32, #tpu.memory_space<vmem>>, vector<1x8x32xf32>
    %50 = vector.shape_cast %49 : vector<1x8x32xf32> to vector<8x32xf32>
    %51 = vector.shape_cast %48 : vector<8x32xf32> to vector<1x8x32xf32>
    tpu.vector_store %arg6[%c0_25, %c0_26, %c128], %51 {strides = array<i32>} : memref<1x8x512xf32, #tpu.memory_space<vmem>>, vector<1x8x32xf32>,
    %52 = vector.extract_strided_slice %47 {offsets = [8, 0], sizes = [8, 32], strides = [1, 1]} : vector<16x32xf32> to vector<8x32xf32>
    %c0_27 = arith.constant 0 : index
    %c0_28 = arith.constant 0 : index
    %c160 = arith.constant 160 : index
    %53 = vector.load %arg6[%c0_27, %c0_28, %c160] : memref<1x8x512xf32, #tpu.memory_space<vmem>>, vector<1x8x32xf32>
    %54 = vector.shape_cast %53 : vector<1x8x32xf32> to vector<8x32xf32>
    %55 = vector.shape_cast %52 : vector<8x32xf32> to vector<1x8x32xf32>
    tpu.vector_store %arg6[%c0_27, %c0_28, %c160], %55 {strides = array<i32>} : memref<1x8x512xf32, #tpu.memory_space<vmem>>, vector<1x8x32xf32>,
    %c3_i32 = arith.constant 3 : i32
    %56 = arith.addi %7, %c3_i32 : i32
    %57 = arith.index_cast %56 : i32 to index
    %c0_29 = arith.constant 0 : index
    %c0_30 = arith.constant 0 : index
    %58 = vector.load %arg7[%57, %c0_29, %c0_30] : memref<18x16x32xbf16, #tpu.memory_space<vmem>>, vector<3x16x32xbf16>
    %59 = vector.shape_cast %58 : vector<3x16x32xbf16> to vector<48x32xbf16>
    %cst_31 = arith.constant dense<0.000000e+00> : vector<16x32xf32>
    %60 = tpu.matmul %3, %59, %cst_31 {dimension_numbers = #tpu.dot_dimension_numbers<[1], [0], [0], [1], [0, 0, 1, 1], [], []>} : vector<16x48xbf16>, vector<48x32xbf16>, vector<16x32xf32> -> vector<16x32xf32>
    %61 = arith.addf %60, %6 : vector<16x32xf32>
    %cst_32 = arith.constant 0.000000e+00 : f32
    %62 = vector.broadcast %cst_32 : f32 to vector<16x32xf32>
    %63 = arith.maximumf %61, %62 : vector<16x32xf32>
    %64 = vector.extract_strided_slice %63 {offsets = [0, 0], sizes = [8, 32], strides = [1, 1]} : vector<16x32xf32> to vector<8x32xf32>
    %c0_33 = arith.constant 0 : index
    %c0_34 = arith.constant 0 : index
    %c192 = arith.constant 192 : index
    %65 = vector.load %arg6[%c0_33, %c0_34, %c192] : memref<1x8x512xf32, #tpu.memory_space<vmem>>, vector<1x8x32xf32>
    %66 = vector.shape_cast %65 : vector<1x8x32xf32> to vector<8x32xf32>
    %67 = vector.shape_cast %64 : vector<8x32xf32> to vector<1x8x32xf32>
    tpu.vector_store %arg6[%c0_33, %c0_34, %c192], %67 {strides = array<i32>} : memref<1x8x512xf32, #tpu.memory_space<vmem>>, vector<1x8x32xf32>,
    %68 = vector.extract_strided_slice %63 {offsets = [8, 0], sizes = [8, 32], strides = [1, 1]} : vector<16x32xf32> to vector<8x32xf32>
    %c0_35 = arith.constant 0 : index
    %c0_36 = arith.constant 0 : index
    %c224 = arith.constant 224 : index
    %69 = vector.load %arg6[%c0_35, %c0_36, %c224] : memref<1x8x512xf32, #tpu.memory_space<vmem>>, vector<1x8x32xf32>
    %70 = vector.shape_cast %69 : vector<1x8x32xf32> to vector<8x32xf32>
    %71 = vector.shape_cast %68 : vector<8x32xf32> to vector<1x8x32xf32>
    tpu.vector_store %arg6[%c0_35, %c0_36, %c224], %71 {strides = array<i32>} : memref<1x8x512xf32, #tpu.memory_space<vmem>>, vector<1x8x32xf32>,
    %c4_i32 = arith.constant 4 : i32
    %72 = arith.addi %7, %c4_i32 : i32
    %73 = arith.index_cast %72 : i32 to index
    %c0_37 = arith.constant 0 : index
    %c0_38 = arith.constant 0 : index
    %74 = vector.load %arg7[%73, %c0_37, %c0_38] : memref<18x16x32xbf16, #tpu.memory_space<vmem>>, vector<3x16x32xbf16>
    %75 = vector.shape_cast %74 : vector<3x16x32xbf16> to vector<48x32xbf16>
    %cst_39 = arith.constant dense<0.000000e+00> : vector<16x32xf32>
    %76 = tpu.matmul %3, %75, %cst_39 {dimension_numbers = #tpu.dot_dimension_numbers<[1], [0], [0], [1], [0, 0, 1, 1], [], []>} : vector<16x48xbf16>, vector<48x32xbf16>, vector<16x32xf32> -> vector<16x32xf32>
    %77 = arith.addf %76, %6 : vector<16x32xf32>
    %cst_40 = arith.constant 0.000000e+00 : f32
    %78 = vector.broadcast %cst_40 : f32 to vector<16x32xf32>
    %79 = arith.maximumf %77, %78 : vector<16x32xf32>
    %80 = vector.extract_strided_slice %79 {offsets = [0, 0], sizes = [8, 32], strides = [1, 1]} : vector<16x32xf32> to vector<8x32xf32>
    %c0_41 = arith.constant 0 : index
    %c0_42 = arith.constant 0 : index
    %c256 = arith.constant 256 : index
    %81 = vector.load %arg6[%c0_41, %c0_42, %c256] : memref<1x8x512xf32, #tpu.memory_space<vmem>>, vector<1x8x32xf32>
    %82 = vector.shape_cast %81 : vector<1x8x32xf32> to vector<8x32xf32>
    %83 = vector.shape_cast %80 : vector<8x32xf32> to vector<1x8x32xf32>
    tpu.vector_store %arg6[%c0_41, %c0_42, %c256], %83 {strides = array<i32>} : memref<1x8x512xf32, #tpu.memory_space<vmem>>, vector<1x8x32xf32>,
    %84 = vector.extract_strided_slice %79 {offsets = [8, 0], sizes = [8, 32], strides = [1, 1]} : vector<16x32xf32> to vector<8x32xf32>
    %c0_43 = arith.constant 0 : index
    %c0_44 = arith.constant 0 : index
    %c288 = arith.constant 288 : index
    %85 = vector.load %arg6[%c0_43, %c0_44, %c288] : memref<1x8x512xf32, #tpu.memory_space<vmem>>, vector<1x8x32xf32>
    %86 = vector.shape_cast %85 : vector<1x8x32xf32> to vector<8x32xf32>
    %87 = vector.shape_cast %84 : vector<8x32xf32> to vector<1x8x32xf32>
    tpu.vector_store %arg6[%c0_43, %c0_44, %c288], %87 {strides = array<i32>} : memref<1x8x512xf32, #tpu.memory_space<vmem>>, vector<1x8x32xf32>,
    %c5_i32 = arith.constant 5 : i32
    %88 = arith.addi %7, %c5_i32 : i32
    %89 = arith.index_cast %88 : i32 to index
    %c0_45 = arith.constant 0 : index
    %c0_46 = arith.constant 0 : index
    %90 = vector.load %arg7[%89, %c0_45, %c0_46] : memref<18x16x32xbf16, #tpu.memory_space<vmem>>, vector<3x16x32xbf16>
    %91 = vector.shape_cast %90 : vector<3x16x32xbf16> to vector<48x32xbf16>
    %cst_47 = arith.constant dense<0.000000e+00> : vector<16x32xf32>
    %92 = tpu.matmul %3, %91, %cst_47 {dimension_numbers = #tpu.dot_dimension_numbers<[1], [0], [0], [1], [0, 0, 1, 1], [], []>} : vector<16x48xbf16>, vector<48x32xbf16>, vector<16x32xf32> -> vector<16x32xf32>
    %93 = arith.addf %92, %6 : vector<16x32xf32>
    %cst_48 = arith.constant 0.000000e+00 : f32
    %94 = vector.broadcast %cst_48 : f32 to vector<16x32xf32>
    %95 = arith.maximumf %93, %94 : vector<16x32xf32>
    %96 = vector.extract_strided_slice %95 {offsets = [0, 0], sizes = [8, 32], strides = [1, 1]} : vector<16x32xf32> to vector<8x32xf32>
    %c0_49 = arith.constant 0 : index
    %c0_50 = arith.constant 0 : index
    %c320 = arith.constant 320 : index
    %97 = vector.load %arg6[%c0_49, %c0_50, %c320] : memref<1x8x512xf32, #tpu.memory_space<vmem>>, vector<1x8x32xf32>
    %98 = vector.shape_cast %97 : vector<1x8x32xf32> to vector<8x32xf32>
    %99 = vector.shape_cast %96 : vector<8x32xf32> to vector<1x8x32xf32>
    tpu.vector_store %arg6[%c0_49, %c0_50, %c320], %99 {strides = array<i32>} : memref<1x8x512xf32, #tpu.memory_space<vmem>>, vector<1x8x32xf32>,
    %100 = vector.extract_strided_slice %95 {offsets = [8, 0], sizes = [8, 32], strides = [1, 1]} : vector<16x32xf32> to vector<8x32xf32>
    %c0_51 = arith.constant 0 : index
    %c0_52 = arith.constant 0 : index
    %c352 = arith.constant 352 : index
    %101 = vector.load %arg6[%c0_51, %c0_52, %c352] : memref<1x8x512xf32, #tpu.memory_space<vmem>>, vector<1x8x32xf32>
    %102 = vector.shape_cast %101 : vector<1x8x32xf32> to vector<8x32xf32>
    %103 = vector.shape_cast %100 : vector<8x32xf32> to vector<1x8x32xf32>
    tpu.vector_store %arg6[%c0_51, %c0_52, %c352], %103 {strides = array<i32>} : memref<1x8x512xf32, #tpu.memory_space<vmem>>, vector<1x8x32xf32>,
    %c6_i32 = arith.constant 6 : i32
    %104 = arith.addi %7, %c6_i32 : i32
    %105 = arith.index_cast %104 : i32 to index
    %c0_53 = arith.constant 0 : index
    %c0_54 = arith.constant 0 : index
    %106 = vector.load %arg7[%105, %c0_53, %c0_54] : memref<18x16x32xbf16, #tpu.memory_space<vmem>>, vector<3x16x32xbf16>
    %107 = vector.shape_cast %106 : vector<3x16x32xbf16> to vector<48x32xbf16>
    %cst_55 = arith.constant dense<0.000000e+00> : vector<16x32xf32>
    %108 = tpu.matmul %3, %107, %cst_55 {dimension_numbers = #tpu.dot_dimension_numbers<[1], [0], [0], [1], [0, 0, 1, 1], [], []>} : vector<16x48xbf16>, vector<48x32xbf16>, vector<16x32xf32> -> vector<16x32xf32>
    %109 = arith.addf %108, %6 : vector<16x32xf32>
    %cst_56 = arith.constant 0.000000e+00 : f32
    %110 = vector.broadcast %cst_56 : f32 to vector<16x32xf32>
    %111 = arith.maximumf %109, %110 : vector<16x32xf32>
    %112 = vector.extract_strided_slice %111 {offsets = [0, 0], sizes = [8, 32], strides = [1, 1]} : vector<16x32xf32> to vector<8x32xf32>
    %c0_57 = arith.constant 0 : index
    %c0_58 = arith.constant 0 : index
    %c384 = arith.constant 384 : index
    %113 = vector.load %arg6[%c0_57, %c0_58, %c384] : memref<1x8x512xf32, #tpu.memory_space<vmem>>, vector<1x8x32xf32>
    %114 = vector.shape_cast %113 : vector<1x8x32xf32> to vector<8x32xf32>
    %115 = vector.shape_cast %112 : vector<8x32xf32> to vector<1x8x32xf32>
    tpu.vector_store %arg6[%c0_57, %c0_58, %c384], %115 {strides = array<i32>} : memref<1x8x512xf32, #tpu.memory_space<vmem>>, vector<1x8x32xf32>,
    %116 = vector.extract_strided_slice %111 {offsets = [8, 0], sizes = [8, 32], strides = [1, 1]} : vector<16x32xf32> to vector<8x32xf32>
    %c0_59 = arith.constant 0 : index
    %c0_60 = arith.constant 0 : index
    %c416 = arith.constant 416 : index
    %117 = vector.load %arg6[%c0_59, %c0_60, %c416] : memref<1x8x512xf32, #tpu.memory_space<vmem>>, vector<1x8x32xf32>
    %118 = vector.shape_cast %117 : vector<1x8x32xf32> to vector<8x32xf32>
    %119 = vector.shape_cast %116 : vector<8x32xf32> to vector<1x8x32xf32>
    tpu.vector_store %arg6[%c0_59, %c0_60, %c416], %119 {strides = array<i32>} : memref<1x8x512xf32, #tpu.memory_space<vmem>>, vector<1x8x32xf32>,
    %c7_i32 = arith.constant 7 : i32
    %120 = arith.addi %7, %c7_i32 : i32
    %121 = arith.index_cast %120 : i32 to index
    %c0_61 = arith.constant 0 : index
    %c0_62 = arith.constant 0 : index
    %122 = vector.load %arg7[%121, %c0_61, %c0_62] : memref<18x16x32xbf16, #tpu.memory_space<vmem>>, vector<3x16x32xbf16>
    %123 = vector.shape_cast %122 : vector<3x16x32xbf16> to vector<48x32xbf16>
    %cst_63 = arith.constant dense<0.000000e+00> : vector<16x32xf32>
    %124 = tpu.matmul %3, %123, %cst_63 {dimension_numbers = #tpu.dot_dimension_numbers<[1], [0], [0], [1], [0, 0, 1, 1], [], []>} : vector<16x48xbf16>, vector<48x32xbf16>, vector<16x32xf32> -> vector<16x32xf32>
    %125 = arith.addf %124, %6 : vector<16x32xf32>
    %cst_64 = arith.constant 0.000000e+00 : f32
    %126 = vector.broadcast %cst_64 : f32 to vector<16x32xf32>
    %127 = arith.maximumf %125, %126 : vector<16x32xf32>
    %128 = vector.extract_strided_slice %127 {offsets = [0, 0], sizes = [8, 32], strides = [1, 1]} : vector<16x32xf32> to vector<8x32xf32>
    %c0_65 = arith.constant 0 : index
    %c0_66 = arith.constant 0 : index
    %c448 = arith.constant 448 : index
    %129 = vector.load %arg6[%c0_65, %c0_66, %c448] : memref<1x8x512xf32, #tpu.memory_space<vmem>>, vector<1x8x32xf32>
    %130 = vector.shape_cast %129 : vector<1x8x32xf32> to vector<8x32xf32>
    %131 = vector.shape_cast %128 : vector<8x32xf32> to vector<1x8x32xf32>
    tpu.vector_store %arg6[%c0_65, %c0_66, %c448], %131 {strides = array<i32>} : memref<1x8x512xf32, #tpu.memory_space<vmem>>, vector<1x8x32xf32>,
    %132 = vector.extract_strided_slice %127 {offsets = [8, 0], sizes = [8, 32], strides = [1, 1]} : vector<16x32xf32> to vector<8x32xf32>
    %c0_67 = arith.constant 0 : index
    %c0_68 = arith.constant 0 : index
    %c480 = arith.constant 480 : index
    %133 = vector.load %arg6[%c0_67, %c0_68, %c480] : memref<1x8x512xf32, #tpu.memory_space<vmem>>, vector<1x8x32xf32>
    %134 = vector.shape_cast %133 : vector<1x8x32xf32> to vector<8x32xf32>
    %135 = vector.shape_cast %132 : vector<8x32xf32> to vector<1x8x32xf32>
    tpu.vector_store %arg6[%c0_67, %c0_68, %c480], %135 {strides = array<i32>} : memref<1x8x512xf32, #tpu.memory_space<vmem>>, vector<1x8x32xf32>,
    return
  }
  func.func @transform_0(%arg0: i32, %arg1: i32) -> (i32, i32, i32) {
    %c0_i32 = arith.constant 0 : i32
    %c0_i32_0 = arith.constant 0 : i32
    %c0_i32_1 = arith.constant 0 : i32
    return %arg0, %c0_i32, %c0_i32_0 : i32, i32, i32
  }
  func.func @transform_1(%arg0: i32, %arg1: i32) -> (i32, i32, i32) {
    %c0_i32 = arith.constant 0 : i32
    %c0_i32_0 = arith.constant 0 : i32
    %c0_i32_1 = arith.constant 0 : i32
    %c0_i32_2 = arith.constant 0 : i32
    return %c0_i32, %c0_i32_0, %c0_i32_1 : i32, i32, i32
  }
  func.func @transform_2(%arg0: i32, %arg1: i32) -> (i32, i32) {
    %c0_i32 = arith.constant 0 : i32
    %c0_i32_0 = arith.constant 0 : i32
    %c0_i32_1 = arith.constant 0 : i32
    return %c0_i32, %c0_i32_0 : i32, i32
  }
  func.func @transform_3(%arg0: i32, %arg1: i32) -> (i32, i32) {
    %c0_i32 = arith.constant 0 : i32
    %c0_i32_0 = arith.constant 0 : i32
    %c0_i32_1 = arith.constant 0 : i32
    return %c0_i32, %c0_i32_0 : i32, i32
  }
  func.func @transform_4(%arg0: i32, %arg1: i32) -> (i32, i32, i32) {
    %c0_i32 = arith.constant 0 : i32
    %c0_i32_0 = arith.constant 0 : i32
    return %arg0, %c0_i32, %arg1 : i32, i32, i32
  }
}

</mosaic_0001>

<bundles_post_ra>
// kernel: unet_decoder_block.1
= control target key start
LH: loop header
LB: loop body
LE: loop exit
PB: predicated region body
PF: predicated region fallthrough
CT: control target
= control target key end

     0   :  { %s2617_s0 = inlined_call_operand.hbm [shape: bf16[2,64,16], index: 0, kind: input, shape index: {}]   ;;  %s2618_s1 = inlined_call_operand.hbm [shape: bf16[3,16,32], index: 1, kind: input, shape index: {}]   ;;  %s2619_s2 = inlined_call_operand.hbm [shape: bf16[16,48], index: 2, kind: input, shape index: {}]   ;;  %s2620_s3 = inlined_call_operand.hbm [shape: f32[16,1], index: 3, kind: input, shape index: {}]   ;;  %s2621_s4 = inlined_call_operand.hbm [shape: f32[2,8,1024], index: 4, kind: output, shape index: {}]  }
   0x1   :  { %2634 = sst [smem:[#allocation20_spill]] %s2618_s1 }
   0x2   :  { %2635 = sst [smem:[#allocation21_spill]] %s2619_s2 }
   0x3   :  { %2636 = sst [smem:[#allocation22_spill]] %s2621_s4 }
   0x4   :  { %9 = vsyncpa [#allocation4], 0 }
   0x5   :  { %11 = vsyncpa [#allocation4 + $0x1], 0 }
   0x6   :  { %12 = vsyncpa [#allocation7], 0 }
   0x7   :  { %13 = vsyncpa [#allocation10], 0 }
   0x8   :  { %14 = vsyncpa [#allocation5], 0 }
   0x9   :  { %16 = vsyncpa [#allocation5 + $0x1], 0  ;;  %s2055_s15 = smov 0   ;;  %s2057_s16 = smov 0  }
   0xa   :  { %s2059_s17 = smov 0   ;;  %s2061_s18 = smov 0  }
   0xb   :  { %s2063_s19 = smov 0   ;;  %s2065_s20 = smov 0  }
   0xc   :  { %s2067_s21 = smov 0   ;;  %s2069_s22 = smov 0  }
   0xd   :  { %s2071_s23 = smov 0   ;;  %s2073_s24 = smov 0  }
   0xe   :  { %s2075_s25 = smov 0  }
   0xf LB: > { %2637 = sst [smem:[#allocation16_spill]] %s1972_s15  ;;  %s1351_s26 = sadd.s32 4294967295, %s2012_s25   ;;  %s2012_s25 = sphi %s2075_s25, %s22_s25   ;;  %s2008_s24 = sphi %s2073_s24, %s2675_s24   ;;  %s2004_s23 = sphi %s2071_s23, %s2674_s23   ;;  %s2000_s22 = sphi %s2069_s22, %s2673_s22   ;;  %s1996_s21 = sphi %s2067_s21, %s2672_s21   ;;  %s1992_s20 = sphi %s2065_s20, %s2671_s20   ;;  %s1988_s19 = sphi %s2063_s19, %s2670_s19   ;;  %s1984_s18 = sphi %s2061_s18, %s2669_s18   ;;  %s1980_s17 = sphi %s2059_s17, %s2668_s17   ;;  %s1976_s16 = sphi %s2057_s16, %s2667_s16   ;;  %s1972_s15 = sphi %s2055_s15, %s2666_s15  }
  0x10   : > { %2638 = sst [smem:[#allocation17_spill]] %s2000_s22  ;;  %s1352_s27 = sadd.s32 4294967294, %s2012_s25  }
  0x11   : > { %p54_p0 = scmp.ne.s32.totalorder %s1988_s19, %s1984_s18  ;;  %p2111_p1 = scmp.eq.s32.totalorder %s1351_s26, 0 }
  0x12   : > { %p142_p2 = scmp.ne.s32.totalorder %s1980_s17, %s1976_s16  ;;  %p143_p4 = scmp.eq.s32.totalorder %s1351_s26, 3 }
  0x13   : > { %s2639_s28 = scalar_select %p2111_p1, 1, 0 }
  0x14   : > { %p2120_p3 = por %p2111_p1, %p54_p0  ;;  %p148_p5 = scmp.ne.s32.totalorder %s1976_s16, %s1972_s15 }
  0x15   : > { %p149_p6 = scmp.eq.s32.totalorder %s1352_s27, 3  ;;  %p2126_p7 = por %p143_p4, %p142_p2 }
  0x16   : > { %s2640_s30 = scalar_select %p2120_p3, 1, 0 }
  0x17   : > { %s2641_s5 = scalar_select %p2126_p7, 1, 0 }
  0x18   : > { %p1353_p8 = scmp.ge.s32.totalorder %s2012_s25, 1  ;;  %p2131_p9 = por %p149_p6, %p148_p5 }
  0x19   : > { %2642 = sst [smem:[#allocation18_spill]] %s2641_s5  ;;  %p156_p10 = scmp.lt.s32.totalorder %s2012_s25, 5 }
  0x1a   : > { %s2643_s6 = scalar_select %p2131_p9, 1, 0 }
  0x1b   : > { %p2136_p11 = pnand %p1353_p8, %p156_p10  ;;  %s2014_s8 = smov [#allocation6]  }
  0x1c   : > { %2644 = sst [smem:[#allocation19_spill]] %s2643_s6  ;;  %s168_s9 = sshll.u32 %s2014_s8, 4  ;;  %s2140_s9 = int_to_ptr.vmem [resolvable:$true] %s168_s9 }
  0x1d   : > { %s2645_s7 = scalar_select %p2136_p11, 1, 0 }
  0x1e   : > { %p1631_p12 = pneg %p2136_p11  ;;  %s2015_s11 = smov [#allocation8]  }
  0x1f   : > { %s181_s12 = sshll.u32 %s2015_s11, 4  ;;  %s2016_s13 = smov [#allocation9]   ;;  %s2150_s12 = int_to_ptr.vmem [resolvable:$true] %s181_s12 }
  0x20   : > { %p2146_p13 = pnand %p1631_p12, %p2111_p1  ;;  %s2152_s14 = sshll.u32 %s2016_s13, 4  ;;  %s195_s14 = int_to_ptr.vmem [resolvable:$true] %s2152_s14 }
  0x21   : > { %s2647_s1 = sld [smem:[#allocation20_spill]] }
  0x22   : > { %p2162_p2 = pneg %p2146_p13 }
  0x27   : > { %s1768_s27 = scalar_lea.hbm %s2647_s1, 384 }
  0x28   : > { %p1769_p0 = scmp.ne.s32.totalorder %s2647_s1, %s1768_s27  ;;  %p1775_p6 = scmp.lt.u32.totalorder %s1768_s27, %s2647_s1 }
  0x2a   : > { %p1771_p4 = pnand %p2162_p2, %p1769_p0 }
  0x2c   : > { %p1772_p5 = pneg %p1771_p4 }
  0x2e   : > { %p1777_p8 = pnand %p1775_p6, %p1772_p5 }
  0x30   : > { %1780 = shalt.err (!%p1777_p8)
}
  0x31   : > { %s1781_s29 = scalar_lea.vmem %s2140_s9, 384  ;;  %p1789_p7 = scmp.lt.s32.totalorder %s2140_s9, %s2140_s9 }
  0x32   : > { %p1782_p10 = scmp.ne.s32.totalorder %s2140_s9, %s1781_s29  ;;  %p1790_p1 = scmp.lt.s32.totalorder %s1781_s29, %s1781_s29 }
  0x34   : > { %p1784_p12 = pnand %p1782_p10, %p2162_p2  ;;  %p1791_p0 = por %p1790_p1, %p1789_p7 }
  0x36   : > { %p1785_p9 = pneg %p1784_p12 }
  0x38   : > { %p1792_p4 = pnand %p1791_p0, %p1785_p9 }
  0x3a   : > { %1795 = shalt.err (!%p1792_p4)
}
  0x3b   : > { %s2632_s18 = smov 64   ;;  %s2633_s26 = smov 4  }
  0x3c   : > { %1634 = dma.hbm_to_vmem [thread:$0]  (!%p2146_p13), %s2647_s1, 384, %s2140_s9, [#allocation7], %s2632_s18, %s2632_s18, %s2633_s26  }
  0x3d   : > { %s2649_s2 = sld [smem:[#allocation21_spill]] }
  0x43   : > { %s1796_s29 = scalar_lea.hbm %s2649_s2, 128 }
  0x44   : > { %p1797_p1 = scmp.ne.s32.totalorder %s2649_s2, %s1796_s29  ;;  %p1803_p5 = scmp.lt.u32.totalorder %s1796_s29, %s2649_s2 }
  0x46   : > { %p1799_p7 = pnand %p1797_p1, %p2162_p2 }
  0x48   : > { %p1800_p9 = pneg %p1799_p7 }
  0x4a   : > { %p1805_p6 = pnand %p1803_p5, %p1800_p9 }
  0x4c   : > { %1808 = shalt.err (!%p1805_p6)
}
  0x4d   : > { %s1809_s9 = scalar_lea.vmem %s2150_s12, 128  ;;  %p1817_p0 = scmp.lt.s32.totalorder %s2150_s12, %s2150_s12 }
  0x4e   : > { %p1810_p8 = scmp.ne.s32.totalorder %s2150_s12, %s1809_s9  ;;  %p1818_p4 = scmp.lt.s32.totalorder %s1809_s9, %s1809_s9 }
  0x50   : > { %p1812_p10 = pnand %p1810_p8, %p2162_p2  ;;  %p1819_p1 = por %p1818_p4, %p1817_p0 }
  0x52   : > { %p1813_p12 = pneg %p1812_p10 }
  0x54   : > { %p1820_p7 = pnand %p1819_p1, %p1813_p12 }
  0x56   : > { %1823 = shalt.err (!%p1820_p7)
}
  0x57   : > { %1637 = dma.hbm_to_vmem [thread:$0]  (!%p2146_p13), %s2649_s2, 128, %s2150_s12, [#allocation7], %s2632_s18, %s2632_s18, %s2633_s26  }
  0x58   : > { %s1824_s27 = scalar_lea.hbm %s2620_s3, 256 }
  0x59   : > { %p1825_p9 = scmp.ne.s32.totalorder %s2620_s3, %s1824_s27  ;;  %p1831_p8 = scmp.lt.u32.totalorder %s1824_s27, %s2620_s3 }
  0x5b   : > { %p1827_p5 = pnand %p1825_p9, %p2162_p2 }
  0x5d   : > { %p1828_p6 = pneg %p1827_p5 }
  0x5f   : > { %p1833_p10 = pnand %p1831_p8, %p1828_p6 }
  0x61   : > { %1836 = shalt.err (!%p1833_p10)
}
  0x62   : > { %s1837_s9 = scalar_lea.vmem %s195_s14, 256  ;;  %p1845_p1 = scmp.lt.s32.totalorder %s195_s14, %s195_s14 }
  0x63   : > { %p1838_p12 = scmp.ne.s32.totalorder %s195_s14, %s1837_s9  ;;  %p1846_p7 = scmp.lt.s32.totalorder %s1837_s9, %s1837_s9 }
  0x65   : > { %p1840_p0 = pnand %p1838_p12, %p2162_p2  ;;  %p1847_p3 = por %p1846_p7, %p1845_p1 }
  0x67   : > { %p1841_p4 = pneg %p1840_p0 }
  0x69   : > { %p1848_p11 = pnand %p1847_p3, %p1841_p4 }
  0x6b   : > { %1851 = shalt.err (!%p1848_p11)
}
  0x6c   : > { %s2019_s12 = smov 128   ;;  %s2020_s6 = smov 8  }
  0x6d   : > { %1640 = dma.hbm_to_vmem [thread:$0]  (!%p2146_p13), %s2620_s3, 256, %s195_s14, [#allocation10], %s2019_s12, %s2019_s12, %s2020_s6  }
  0x6e   : > { %s31_s22 = sadd.s32 1, %s2004_s23  ;;  %s34_s5 = sadd.s32 1, %s2008_s24 }
  0x6f   : > { %p32_p3 = scmp.ge.s32.totalorder %s31_s22, 2  ;;  %s41_s27 = sadd.s32 1, %s1992_s20 }
  0x70   : > { %p48_p11 = scmp.ne.s32.totalorder %s1992_s20, %s1988_s19  ;;  %p49_p2 = scmp.eq.s32.totalorder %s2012_s25, 0 }
  0x71   : > { %s2677_s22 = smov (%p32_p3, %s31_s22), 0  ;;  %s2679_s5 = smov (!%p32_p3, %s34_s5), %s2008_s24 }
  0x72   : > { %s128_s10 = ssub.s32 %s2004_s23, %s2677_s22  ;;  %p36_p9 = scmp.ge.s32.totalorder %s2679_s5, 2 }
  0x73   : > { %p1652_p5 = scmp.lt.s32.totalorder %s2012_s25, 4  ;;  %p2243_p13 = por %p49_p2, %p48_p11 }
  0x74   : > { %s208_s8 = sand.u32 1, %s1992_s20   ;;  %s2681_s5 = smov (%p36_p9, %s2679_s5), 0 }
  0x75   : > { %s1358_s11 = sshll.u32 %s208_s8, 5  ;;  %s38_s13 = ssub.s32 %s2008_s24, %s2681_s5 }
  0x76   : > { %p39_p6 = scmp.eq.s32.totalorder %s38_s13, 0  ;;  %s129_s29 = sor.u32 %s128_s10, %s38_s13 }
  0x77   : > { %p130_p8 = scmp.eq.s32.totalorder %s129_s29, 0  ;;  %s1447_s9 = sshll.u32 %s2008_s24, 9 }
  0x78   : > { %s2254_s12 = scalar_select %p39_p6, %s1992_s20, %s41_s27  }
  0x79   : > { %s2651_s6 = sadd.s32 1, %s1980_s17  ;;  %s2264_s26 = scalar_lea.hbm %s2617_s0, %s1447_s9 }
  0x7a   : > { %s2259_s4 = scalar_select %p130_p8, %s1980_s17, %s2651_s6  }
  0x7b   : > { %s212_s1 = scalar_lea.vmem [#allocation3], %s1358_s11  ;;  %p2272_p10 = pnand %p1652_p5, %p2243_p13 }
  0x7c   : > { %s219_s2 = sshll.u32 %s212_s1, 4  ;;  %s2276_s10 = scalar_lea.sflag [#allocation4], %s208_s8  ;;  %s2266_s2 = int_to_ptr.vmem [resolvable:$true] %s219_s2 }
  0x7d   : > { %s1852_s18 = scalar_lea.hbm %s2264_s26, 512  ;;  %p1854_p0 = pneg %p2272_p10 }
  0x7e   : > { %p1853_p12 = scmp.ne.s32.totalorder %s2264_s26, %s1852_s18  ;;  %s1857_s14 = scalar_lea.hbm %s2617_s0, 1024 }
  0x7f   : > { %p1858_p7 = scmp.lt.u32.totalorder %s2264_s26, %s2617_s0  ;;  %p1859_p3 = scmp.lt.u32.totalorder %s1857_s14, %s1852_s18 }
  0x80   : > { %p1855_p4 = pnand %p1854_p0, %p1853_p12  ;;  %p1861_p2 = scmp.lt.u32.totalorder %s1852_s18, %s2264_s26 }
  0x81   : > { %p1860_p11 = por %p1859_p3, %p1858_p7 }
  0x82   : > { %p1856_p1 = pneg %p1855_p4 }
  0x83   : > { %p1862_p9 = por %p1861_p2, %p1860_p11 }
  0x85   : > { %p1863_p5 = pnand %p1862_p9, %p1856_p1 }
  0x87   : > { %1866 = shalt.err (!%p1863_p5)
}
  0x88   : > { %s1867_s8 = scalar_lea.vmem %s2266_s2, 512  ;;  %s2021_s9 = smov [#allocation3]  }
  0x89   : > { %p1868_p13 = scmp.ne.s32.totalorder %s2266_s2, %s1867_s8  ;;  %s1872_s6 = sshll.u32 %s2021_s9, 4  ;;  %s1873_s6 = int_to_ptr.vmem [resolvable:$false] %s1872_s6 }
  0x8a   : > { %s1874_s15 = scalar_lea.vmem %s1873_s6, 1024  ;;  %p1875_p12 = scmp.lt.s32.totalorder %s2266_s2, %s1873_s6 }
  0x8b   : > { %p1870_p6 = pnand %p1868_p13, %p1854_p0  ;;  %p1876_p4 = scmp.lt.s32.totalorder %s1874_s15, %s1867_s8 }
  0x8d   : > { %p1871_p8 = pneg %p1870_p6  ;;  %p1877_p7 = por %p1876_p4, %p1875_p12 }
  0x8f   : > { %p1878_p3 = pnand %p1877_p7, %p1871_p8 }
  0x91   : > { %1881 = shalt.err (!%p1878_p3)
}
  0x92   : > { %s2653_s18 = smov 4   ;;  %s2654_s1 = smov 64  }
  0x93   : > { %1644 = dma.hbm_to_vmem [thread:$0]  (!%p2272_p10), %s2264_s26, 512, %s2266_s2, %s2276_s10, %s2654_s1, %s2654_s1, %s2653_s18  }
  0x94   : > { %p2655_p0 = scmp.ne.s32.totalorder %s2645_s7, 0 }
  0x95   : > { %s233_s11 = sand.u32 (!%p2655_p0), 1, %s1988_s19   ;;  %p2656_p1 = scmp.ne.s32.totalorder (!%p2655_p0), %s2640_s30, 0 }
  0x96   : > { %231 = sbr.rel (%p2655_p0) target bundleno = 818 (0x332), region = 36  ;;  %s1362_s14 = sshll.u32 (!%p2655_p0), %s233_s11, 5 }
  0x97   : > { %s234_s13 = scalar_lea.sflag (!%p2655_p0), [#allocation4], %s233_s11  ;;  %s237_s29 = scalar_lea.vmem (!%p2655_p0), [#allocation3], %s1362_s14 }
  0x9d   : > { %1955 = dma.done.wait (%p2656_p1), %s234_s13, 512  }
  0x9e   : > { %1957 = vsyncadd (%p2656_p1), %s234_s13, 4294966784  ;;  %p2657_p11 = scmp.ne.s32.totalorder %s2639_s28, 0 }
  0xa0   : > { %1959 = dma.done.wait (%p2657_p11), [#allocation7], 512  }
  0xa1   : > { %1961 = vsyncadd (%p2657_p11), [#allocation7], 4294966784 }
  0xa2   : > { %1963 = dma.done.wait (%p2657_p11), [#allocation10], 256  }
  0xa3   : > { %1965 = vsyncadd (%p2657_p11), [#allocation10], 4294967040  ;;  %s271_s2 = sand.u32 1, %s1976_s16   ;;  %p1367_p10 = scmp.ne.s32.totalorder %s1996_s21, 0 }
  0xa4   : > { %s1366_s7 = sshll.u32 %s271_s2, 5  ;;  %v1759_v0 = vld [vmem:[#allocation6] sm:$0xff] (!%p1367_p10)   ;;  %vm316_vm0 = vcmask (!%p1367_p10), 130048   ;;  %v1761_v2 = vld [vmem:[%s237_s29 + $0x10] sm:$0xff] (!%p1367_p10)   ;;  %v1762_v3 = vld [vmem:[%s237_s29 + $0x8] sm:$0xff] (!%p1367_p10)   ;;  %vm688_vm1 = vcmask (!%p1367_p10), 261120  }
  0xa5   : > { %s2325_s26 = scalar_lea.vmem [#allocation11], %s1366_s7  ;;  %279 = sbr.rel (%p1367_p10) target bundleno = 411 (0x19b), region = 56  ;;  %v1760_v1 = vld [vmem:[%s237_s29] sm:$0xff] (!%p1367_p10)   ;;  %1503 = vmatprep.subr.bf16.mxu0 (!%p1367_p10), %v1759_v0  ;;  %1613 = vmatprep.subr.bf16.mxu1 (!%p1367_p10), %v1759_v0  ;;  %v1763_v4 = vld [vmem:[%s237_s29 + $0x18] sm:$0xff] (!%p1367_p10)   ;;  %v1764_v5 = vld [vmem:[#allocation6 + $0x8] sm:$0xff] (!%p1367_p10)   ;;  %v2022_v7 = vmov (!%p1367_p10), 0  }
  0xa6   : > { %1504 = vmatpush3.bf16.msra.mxu0 (!%p1367_p10), %v1759_v0  ;;  %1614 = vmatpush3.bf16.msra.mxu1 (!%p1367_p10), %v1759_v0  ;;  %v1765_v6 = vld [vmem:[#allocation6 + $0x10] sm:$0xff] (!%p1367_p10)   ;;  %705 = vst.msk [vmem:[#allocation2] sm:$0xff] (!%p1367_p10), %vm688_vm1, %v2022_v7  ;;  %707 = vst.msk [vmem:[#allocation2 + $0x88] sm:$0xff] (!%p1367_p10), %vm688_vm1, %v2022_v7  ;;  %vm638_vm2 = vcmask (!%p1367_p10), 1043456  }
  0xa7   : > { %1505 = vmatprep.mubr.msk.bf16.mxu0 (!%p1367_p10), %vm316_vm0, %v1760_v1  ;;  %1509 = vmatprep.mubr.msk.bf16.mxu1 (!%p1367_p10), %vm316_vm0, %v1761_v2 }
  0xa8   : > { %1513 = vmatprep.subr.bf16.mxu1 (!%p1367_p10), %v1764_v5  ;;  %1523 = vmatprep.subr.bf16.mxu0 (!%p1367_p10), %v1765_v6 }
  0xa9   : > { %1506 = vmatmul.mubr.msk.bf16.vlgmr.msra.gmra.mrb[0].mxu0 (!%p1367_p10), %vm316_vm0, %v1762_v3  ;;  %1510 = vmatmul.mubr.msk.bf16.vlgmr.msra.gmra.mrb[0].mxu1 (!%p1367_p10), %vm316_vm0, %v1763_v4 }
  0xaa   : > { %1515 = vmatprep.mubr.msk.bf16.mxu1 (!%p1367_p10), %vm316_vm0, %v1760_v1  ;;  %1514 = vmatpush3.bf16.msra.mxu1 (!%p1367_p10), %v1764_v5 }
  0xab   : > { %1524 = vmatpush3.bf16.msra.mxu0 (!%p1367_p10), %v1765_v6  ;;  %1525 = vmatprep.mubr.msk.bf16.mxu0 (!%p1367_p10), %vm316_vm0, %v1760_v1 }
  0xb1   : > { %1516 = vmatmul.mubr.msk.bf16.vlgmr.msra.gmra.mrb[4].mxu1 %vm316_vm0, %v1762_v3  ;;  %1526 = vmatmul.mubr.msk.bf16.vlgmr.msra.gmra.mrb[4].mxu0 %vm316_vm0, %v1762_v3 }
  0xb2   : > { %1519 = vmatprep.mubr.msk.bf16.mxu1 %vm316_vm0, %v1761_v2  ;;  %1529 = vmatprep.mubr.msk.bf16.mxu0 %vm316_vm0, %v1761_v2 }
  0xb9   : > { %1520 = vmatmul.mubr.msk.bf16.gmra.mrb[8].mxu1 %vm316_vm0, %v1763_v4  ;;  %1530 = vmatmul.mubr.msk.bf16.gmra.mrb[8].mxu0 %vm316_vm0, %v1763_v4 }
 0x17c   : > { %v1507_v8 = vpop.f32.mrb[0].mxu0  ;;  %v2342_v9 = vpop.f32.mrb[0].mxu1 }
 0x17d   : > { %v363_v10 = vpop.f32.mrb[1].mxu0  ;;  %v2344_v11 = vpop.f32.mrb[1].mxu1  ;;  %v404_v16 = vcombine.high %v1507_v8, %v1507_v8  ;;  %v408_v17 = vcombine.high %v2342_v9, %v2342_v9 }
 0x17e   : > { %v1508_v12 = vpop.f32.mrb[2].mxu0  ;;  %v2346_v13 = vpop.f32.mrb[2].mxu1  ;;  %v402_v18 = vcombine.high %v363_v10, %v363_v10  ;;  %v406_v19 = vcombine.high %v2344_v11, %v2344_v11 }
 0x17f   : > { %v366_v14 = vpop.f32.mrb[3].mxu0  ;;  %v2348_v15 = vpop.f32.mrb[3].mxu1  ;;  %v405_v20 = vcombine.high %v1508_v12, %v1508_v12  ;;  %v409_v21 = vcombine.high %v2346_v13, %v2346_v13 }
 0x180   : > { %v403_v22 = vcombine.high %v366_v14, %v366_v14  ;;  %v407_v23 = vcombine.high %v2348_v15, %v2348_v15 }
 0x184   : > { %v1517_v24 = vpop.f32.mrb[4].mxu1  ;;  %v1527_v25 = vpop.f32.mrb[4].mxu0 }
 0x185   : > { %v610_v26 = vcombine.low %v1517_v24, %v1517_v24  ;;  %v1389_v27 = vcombine.high %v1517_v24, %v1517_v24  ;;  %v592_v28 = vcombine.high %v1527_v25, %v1527_v25  ;;  %v659_v29 = vsel %vm638_vm2, %v1527_v25, 0.0  ;;  %v461_v30 = vpop.f32.mrb[5].mxu1  ;;  %v551_v31 = vpop.f32.mrb[5].mxu0 }
 0x186   : > { %v606_v32 = vcombine.low %v461_v30, %v461_v30  ;;  %v1387_v33 = vcombine.high %v461_v30, %v461_v30  ;;  %v590_v34 = vcombine.high %v551_v31, %v551_v31  ;;  %v655_v35 = vsel %vm638_vm2, %v551_v31, 0.0  ;;  %v1518_v36 = vpop.f32.mrb[6].mxu1  ;;  %v1528_v37 = vpop.f32.mrb[6].mxu0 }
 0x187   : > { %v643_v38 = vsel %vm638_vm2, %v1507_v8, %v610_v26  ;;  %v644_v39 = vsel %vm638_vm2, %v404_v16, %v1389_v27  ;;  %v660_v40 = vsel %vm638_vm2, %v592_v28, 0.0  ;;  %v612_v41 = vcombine.low %v1518_v36, %v1518_v36  ;;  %v464_v42 = vpop.f32.mrb[7].mxu1  ;;  %v554_v43 = vpop.f32.mrb[7].mxu0 }
 0x188   : > { %v675_v44 = vpack.c.bf16 %v659_v29, %v643_v38  ;;  %v676_v45 = vpack.c.bf16 %v660_v40, %v644_v39  ;;  %v639_v46 = vsel %vm638_vm2, %v363_v10, %v606_v32  ;;  %v640_v47 = vsel %vm638_vm2, %v402_v18, %v1387_v33 }
 0x189   : > { %v656_v48 = vsel %vm638_vm2, %v590_v34, 0.0  ;;  %v671_v49 = vpack.c.bf16 %v655_v35, %v639_v46  ;;  %v1390_v50 = vcombine.high %v1518_v36, %v1518_v36  ;;  %v593_v51 = vcombine.high %v1528_v37, %v1528_v37 }
 0x18a   : > { %693 = vst.msk [vmem:[#allocation2 + $0x28] sm:$0xff] %vm688_vm1, %v675_v44  ;;  %694 = vst.msk [vmem:[#allocation2 + $0x30] sm:$0xff] %vm688_vm1, %v676_v45  ;;  %v672_v52 = vpack.c.bf16 %v656_v48, %v640_v47  ;;  %v645_v53 = vsel %vm638_vm2, %v1508_v12, %v612_v41  ;;  %v661_v54 = vsel %vm638_vm2, %v1528_v37, 0.0  ;;  %v608_v55 = vcombine.low %v464_v42, %v464_v42 }
 0x18b   : > { %689 = vst.msk [vmem:[#allocation2 + $0x8] sm:$0xff] %vm688_vm1, %v671_v49  ;;  %v646_v56 = vsel %vm638_vm2, %v405_v20, %v1390_v50  ;;  %v662_v57 = vsel %vm638_vm2, %v593_v51, 0.0  ;;  %v677_v58 = vpack.c.bf16 %v661_v54, %v645_v53  ;;  %v1388_v59 = vcombine.high %v464_v42, %v464_v42 }
 0x18c   : > { %690 = vst.msk [vmem:[#allocation2 + $0x10] sm:$0xff] %vm688_vm1, %v672_v52  ;;  %v678_v60 = vpack.c.bf16 %v662_v57, %v646_v56  ;;  %v591_v61 = vcombine.high %v554_v43, %v554_v43  ;;  %v641_v62 = vsel %vm638_vm2, %v366_v14, %v608_v55  ;;  %v657_v63 = vsel %vm638_vm2, %v554_v43, 0.0  ;;  %v1521_v0 = vpop.f32.mrb[8].mxu1  ;;  %v1531_v1 = vpop.f32.mrb[8].mxu0 }
 0x18d   : > { %695 = vst.msk [vmem:[#allocation2 + $0x38] sm:$0xff] %vm688_vm1, %v677_v58  ;;  %v642_v2 = vsel %vm638_vm2, %v403_v22, %v1388_v59  ;;  %v673_v3 = vpack.c.bf16 %v657_v63, %v641_v62  ;;  %v618_v4 = vcombine.low %v1521_v0, %v1521_v0  ;;  %v1393_v5 = vcombine.high %v1521_v0, %v1521_v0  ;;  %v477_v6 = vpop.f32.mrb[9].mxu1  ;;  %v567_v7 = vpop.f32.mrb[9].mxu0 }
 0x18e   : > { %696 = vst.msk [vmem:[#allocation2 + $0x40] sm:$0xff] %vm688_vm1, %v678_v60  ;;  %v658_v8 = vsel %vm638_vm2, %v591_v61, 0.0  ;;  %v596_v10 = vcombine.high %v1531_v1, %v1531_v1  ;;  %v667_v12 = vsel %vm638_vm2, %v1531_v1, 0.0  ;;  %v614_v14 = vcombine.low %v477_v6, %v477_v6  ;;  %v1522_v16 = vpop.f32.mrb[10].mxu1  ;;  %v1532_v18 = vpop.f32.mrb[10].mxu0 }
 0x18f   : > { %v674_v20 = vpack.c.bf16 %v658_v8, %v642_v2  ;;  %691 = vst.msk [vmem:[#allocation2 + $0x18] sm:$0xff] %vm688_vm1, %v673_v3  ;;  %v651_v22 = vsel %vm638_vm2, %v2342_v9, %v618_v4  ;;  %v652_v24 = vsel %vm638_vm2, %v408_v17, %v1393_v5  ;;  %v1391_v25 = vcombine.high %v477_v6, %v477_v6  ;;  %v480_v26 = vpop.f32.mrb[11].mxu1  ;;  %v570_v27 = vpop.f32.mrb[11].mxu0 }
 0x190   : > { %v668_v28 = vsel %vm638_vm2, %v596_v10, 0.0  ;;  %v683_v29 = vpack.c.bf16 %v667_v12, %v651_v22  ;;  %v594_v30 = vcombine.high %v567_v7, %v567_v7  ;;  %v647_v31 = vsel %vm638_vm2, %v2344_v11, %v614_v14 }
 0x191   : > { %692 = vst.msk [vmem:[#allocation2 + $0x20] sm:$0xff] %vm688_vm1, %v674_v20  ;;  %v684_v32 = vpack.c.bf16 %v668_v28, %v652_v24  ;;  %v648_v9 = vsel %vm638_vm2, %v406_v19, %v1391_v25  ;;  %v663_v17 = vsel %vm638_vm2, %v567_v7, 0.0  ;;  %v620_v33 = vcombine.low %v1522_v16, %v1522_v16 }
 0x192   : > { %701 = vst.msk [vmem:[#allocation2 + $0x68] sm:$0xff] %vm688_vm1, %v683_v29  ;;  %v664_v34 = vsel %vm638_vm2, %v594_v30, 0.0  ;;  %v679_v35 = vpack.c.bf16 %v663_v17, %v647_v31  ;;  %v1394_v36 = vcombine.high %v1522_v16, %v1522_v16  ;;  %v597_v37 = vcombine.high %v1532_v18, %v1532_v18 }
 0x193   : > { %702 = vst.msk [vmem:[#allocation2 + $0x70] sm:$0xff] %vm688_vm1, %v684_v32  ;;  %v680_v38 = vpack.c.bf16 %v664_v34, %v648_v9  ;;  %v653_v39 = vsel %vm638_vm2, %v2346_v13, %v620_v33  ;;  %v669_v11 = vsel %vm638_vm2, %v1532_v18, 0.0  ;;  %v616_v40 = vcombine.low %v480_v26, %v480_v26 }
 0x194   : > { %697 = vst.msk [vmem:[#allocation2 + $0x48] sm:$0xff] %vm688_vm1, %v679_v35  ;;  %v654_v19 = vsel %vm638_vm2, %v409_v21, %v1394_v36  ;;  %v670_v41 = vsel %vm638_vm2, %v597_v37, 0.0  ;;  %v685_v42 = vpack.c.bf16 %v669_v11, %v653_v39  ;;  %v1392_v43 = vcombine.high %v480_v26, %v480_v26 }
 0x195   : > { %698 = vst.msk [vmem:[#allocation2 + $0x50] sm:$0xff] %vm688_vm1, %v680_v38  ;;  %v686_v44 = vpack.c.bf16 %v670_v41, %v654_v19  ;;  %v595_v45 = vcombine.high %v570_v27, %v570_v27  ;;  %v649_v46 = vsel %vm638_vm2, %v2348_v15, %v616_v40  ;;  %v665_v47 = vsel %vm638_vm2, %v570_v27, 0.0 }
 0x196   : > { %703 = vst.msk [vmem:[#allocation2 + $0x78] sm:$0xff] %vm688_vm1, %v685_v42  ;;  %v650_v13 = vsel %vm638_vm2, %v407_v23, %v1392_v43  ;;  %v681_v21 = vpack.c.bf16 %v665_v47, %v649_v46 }
 0x197   : > { %704 = vst.msk [vmem:[#allocation2 + $0x80] sm:$0xff] %vm688_vm1, %v686_v44  ;;  %v666_v48 = vsel %vm638_vm2, %v595_v45, 0.0 }
 0x198   : > { %v682_v49 = vpack.c.bf16 %v666_v48, %v650_v13  ;;  %699 = vst.msk [vmem:[#allocation2 + $0x58] sm:$0xff] %vm688_vm1, %v681_v21 }
 0x19a   : > { %700 = vst.msk [vmem:[#allocation2 + $0x60] sm:$0xff] %vm688_vm1, %v682_v49 }
 0x19b PF: > { %s1448_s28 = sshll.u32 %s1996_s21, 6  ;;  %v2023_v50 = vmov 0.0   ;;  %vm2024_vm3 = vmmov 0   ;;  %v711_v51 = vld [vmem:[#allocation9 + $0x8] sm:$0xff]  ;;  %v2025_v53 = vmov 0   ;;  %v710_v54 = vld [vmem:[#allocation9] sm:$0xff] }
 0x19c   : > { %1533 = vmatprep.subr.bf16.mxu0 %v2023_v50  ;;  %1543 = vmatprep.subr.bf16.mxu1 %v2023_v50  ;;  %s2425_s30 = scalar_lea.vmem [#allocation2], %s1448_s28  ;;  %v1767_v56 = vld [vmem:[#allocation8] sm:$0xff]   ;;  %vm733_vm4 = vcmask 392192   ;;  %vm780_vm5 = vcmask 261120   ;;  %s2026_s27 = smov 64   ;;  %vm786_vm6 = vcmask 523520  }
 0x19d   : > { %1539 = vmatprep.mubr.msk.bf16.mxu0 %vm2024_vm3, %v2023_v50  ;;  %1549 = vmatprep.mubr.msk.bf16.mxu1 %vm2024_vm3, %v2023_v50  ;;  %s2027_s10 = smov 32   ;;  %s2028_s8 = smov 96   ;;  %vm841_vm7 = vcmask 785920   ;;  %vm847_vm8 = vcmask 1048320  }
 0x19e   : > { %1766 = vset.pattern.permute.xlu0 %v2025_v53  ;;  %s2658_s9 = sld [smem:[#allocation17_spill]]  ;;  %s1442_s6 = sshll.u32 %s1996_s21, 2 }
 0x19f   : > { %719 = vperm.xlu0 %1766, %v711_v51   ;;  %s2659_s15 = sld [smem:[#allocation18_spill]]  ;;  %s1208_s14 = sshll.u32 %s2325_s26, 4  ;;  %s2553_s14 = int_to_ptr.vmem [resolvable:$true] %s1208_s14 }
 0x1a0   : > { %s2660_s7 = sld [smem:[#allocation22_spill]]  ;;  %s1192_s21 = scalar_lea.sflag [#allocation5], %s271_s2 }
 0x1a1   : > { %v725_v15 = vld [vmem:[%s2425_s30] sm:$0xff]  ;;  %v1401_v23 = vld [vmem:[%s2425_s30 + $0x8] sm:$0xff]  ;;  %v1402_v52 = vld [vmem:[%s2425_s30 + $0x10] sm:$0xff] }
 0x1a2   : > { %1534 = vmatpush3.bf16.msra.mxu0 %v725_v15  ;;  %1544 = vmatpush3.bf16.msra.mxu1 %v1401_v23  ;;  %v1403_v55 = vld [vmem:[%s2425_s30 + $0x18] sm:$0xff]  ;;  %v1414_v57 = vld [vmem:[%s2425_s30 + $0x20] sm:$0xff]  ;;  %v1415_v58 = vld [vmem:[%s2425_s30 + $0x28] sm:$0xff] }
 0x1a3   : > { %1535 = vmatprep.subr.bf16.mxu0 %v2023_v50  ;;  %1545 = vmatprep.subr.bf16.mxu1 %v2023_v50  ;;  %v1426_v59 = vld [vmem:[%s2425_s30 + $0x30] sm:$0xff]  ;;  %v1427_v60 = vld [vmem:[%s2425_s30 + $0x38] sm:$0xff]  ;;  %v1438_v61 = vld [vmem:[%s2425_s30 + $0x40] sm:$0xff] }
 0x1a4   : > { %714 = vperm.xlu0 %1766, %v710_v54   ;;  %v1439_v62 = vld [vmem:[%s2425_s30 + $0x48] sm:$0xff]  ;;  %s1443_s18 = sshll.u32 %s2658_s9, 3  ;;  %s1882_s30 = scalar_lea.vmem %s2553_s14, 512 }
 0x1a5   : > { %s1204_s1 = sadd.s32 %s1443_s18, %s1442_s6  ;;  %p1883_p2 = scmp.ne.s32.totalorder %s2553_s14, %s1882_s30 }
 0x1a6   : > { %1536 = vmatpush3.bf16.msra.mxu0 %v1401_v23  ;;  %1546 = vmatpush3.bf16.msra.mxu1 %v1402_v52  ;;  %s1444_s11 = sshll.u32 %s1204_s1, 7  ;;  %p2661_p9 = scmp.ne.s32.totalorder %s2659_s15, 0 }
 0x1a7   : > { %1537 = vmatprep.subr.bf16.mxu0 %v2023_v50  ;;  %1547 = vmatprep.subr.bf16.mxu1 %v2023_v50  ;;  %s2551_s28 = scalar_lea.hbm %s2660_s7, %s1444_s11 }
 0x1a8   : > { %p1884_p5 = pnand %p1883_p2, %p2661_p9 }
 0x1aa   : > { %1538 = vmatpush3.bf16.msra.mxu0 %v1402_v52  ;;  %1548 = vmatpush3.bf16.msra.mxu1 %v1403_v55  ;;  %p1885_p13 = pneg %p1884_p5 }
 0x1ab   : > { %1553 = vmatprep.subr.bf16.mxu0 %v2023_v50  ;;  %1563 = vmatprep.subr.bf16.mxu1 %v2023_v50 }
 0x1ad   : > { %1540 = vmatmul.mubr.msk.bf16.vlgmr.msra.gmra.mrb[0].mxu0 %vm733_vm4, %v1767_v56  ;;  %1550 = vmatmul.mubr.msk.bf16.vlgmr.msra.gmra.mrb[0].mxu1 %vm733_vm4, %v1767_v56 }
 0x1ae   : > { %1554 = vmatpush3.bf16.msra.mxu0 %v1402_v52  ;;  %1564 = vmatpush3.bf16.msra.mxu1 %v1403_v55 }
 0x1af   : > { %1555 = vmatprep.subr.bf16.mxu0 %v2023_v50  ;;  %1565 = vmatprep.subr.bf16.mxu1 %v2023_v50 }
 0x1b0   : > { %1559 = vmatprep.mubr.msk.bf16.mxu0 %vm2024_vm3, %v2023_v50  ;;  %1569 = vmatprep.mubr.msk.bf16.mxu1 %vm2024_vm3, %v2023_v50 }
 0x1b2   : > { %1556 = vmatpush3.bf16.msra.mxu0 %v1403_v55  ;;  %1566 = vmatpush3.bf16.msra.mxu1 %v1414_v57 }
 0x1b3   : > { %1557 = vmatprep.subr.bf16.mxu0 %v2023_v50  ;;  %1567 = vmatprep.subr.bf16.mxu1 %v2023_v50 }
 0x1b6   : > { %1558 = vmatpush3.bf16.msra.mxu0 %v1414_v57  ;;  %1568 = vmatpush3.bf16.msra.mxu1 %v1415_v58 }
 0x1b7   : > { %1573 = vmatprep.subr.bf16.mxu0 %v2023_v50  ;;  %1583 = vmatprep.subr.bf16.mxu1 %v2023_v50 }
 0x1b9   : > { %1560 = vmatmul.mubr.msk.bf16.vlgmr.msra.gmra.mrb[4].mxu0 %vm733_vm4, %v1767_v56  ;;  %1570 = vmatmul.mubr.msk.bf16.vlgmr.msra.gmra.mrb[4].mxu1 %vm733_vm4, %v1767_v56 }
 0x1ba   : > { %1574 = vmatpush3.bf16.msra.mxu0 %v1414_v57  ;;  %1584 = vmatpush3.bf16.msra.mxu1 %v1415_v58 }
 0x1bb   : > { %1575 = vmatprep.subr.bf16.mxu0 %v2023_v50  ;;  %1585 = vmatprep.subr.bf16.mxu1 %v2023_v50 }
 0x1bc   : > { %1579 = vmatprep.mubr.msk.bf16.mxu0 %vm2024_vm3, %v2023_v50  ;;  %1589 = vmatprep.mubr.msk.bf16.mxu1 %vm2024_vm3, %v2023_v50 }
 0x1be   : > { %1576 = vmatpush3.bf16.msra.mxu0 %v1415_v58  ;;  %1586 = vmatpush3.bf16.msra.mxu1 %v1426_v59 }
 0x1bf   : > { %1577 = vmatprep.subr.bf16.mxu0 %v2023_v50  ;;  %1587 = vmatprep.subr.bf16.mxu1 %v2023_v50 }
 0x1c2   : > { %1578 = vmatpush3.bf16.msra.mxu0 %v1426_v59  ;;  %1588 = vmatpush3.bf16.msra.mxu1 %v1427_v60 }
 0x1c3   : > { %1593 = vmatprep.subr.bf16.mxu0 %v2023_v50  ;;  %1603 = vmatprep.subr.bf16.mxu1 %v2023_v50 }
 0x1c5   : > { %1580 = vmatmul.mubr.msk.bf16.vlgmr.msra.gmra.mrb[8].mxu0 %vm733_vm4, %v1767_v56  ;;  %1590 = vmatmul.mubr.msk.bf16.vlgmr.msra.gmra.mrb[8].mxu1 %vm733_vm4, %v1767_v56 }
 0x1c6   : > { %1594 = vmatpush3.bf16.msra.mxu0 %v1426_v59  ;;  %1604 = vmatpush3.bf16.msra.mxu1 %v1427_v60 }
 0x1c7   : > { %1595 = vmatprep.subr.bf16.mxu0 %v2023_v50  ;;  %1605 = vmatprep.subr.bf16.mxu1 %v2023_v50 }
 0x1c8   : > { %1599 = vmatprep.mubr.msk.bf16.mxu0 %vm2024_vm3, %v2023_v50  ;;  %1609 = vmatprep.mubr.msk.bf16.mxu1 %vm2024_vm3, %v2023_v50 }
 0x1ca   : > { %1596 = vmatpush3.bf16.msra.mxu0 %v1427_v60  ;;  %1606 = vmatpush3.bf16.msra.mxu1 %v1438_v61 }
 0x1cb   : > { %1597 = vmatprep.subr.bf16.mxu0 %v2023_v50  ;;  %1607 = vmatprep.subr.bf16.mxu1 %v2023_v50 }
 0x1ce   : > { %1598 = vmatpush3.bf16.msra.mxu0 %v1438_v61  ;;  %1608 = vmatpush3.bf16.msra.mxu1 %v1439_v62 }
 0x1d1   : > { %1600 = vmatmul.mubr.msk.bf16.vlgmr.msra.gmra.mrb[12].mxu0 %vm733_vm4, %v1767_v56  ;;  %1610 = vmatmul.mubr.msk.bf16.vlgmr.msra.gmra.mrb[12].mxu1 %vm733_vm4, %v1767_v56 }
 0x21e   : > { %v2483_v63 = vpop.permute.xlu0 %719 }
 0x223   : > { %v2485_v0 = vpop.permute.xlu0 %714 }
 0x280   : > { %v771_v1 = vpop.f32.mrb[0].mxu0  ;;  %v828_v2 = vpop.f32.mrb[0].mxu1 }
 0x281   : > { %v772_v3 = vadd.f32 %v771_v1, %v2485_v0  ;;  %v829_v4 = vadd.f32 %v828_v2, %v2485_v0  ;;  %v1541_v5 = vpop.f32.mrb[1].mxu0  ;;  %v1551_v6 = vpop.f32.mrb[1].mxu1 }
 0x282   : > { %v774_v7 = vpop.f32.mrb[2].mxu0  ;;  %v831_v8 = vpop.f32.mrb[2].mxu1 }
 0x283   : > { %v778_v10 = vmax.f32 %v772_v3, 0.0  ;;  %v835_v12 = vmax.f32 %v829_v4, 0.0  ;;  %v775_v14 = vadd.f32 %v774_v7, %v2483_v63  ;;  %v832_v16 = vadd.f32 %v831_v8, %v2483_v63  ;;  %v1542_v18 = vpop.f32.mrb[3].mxu0  ;;  %v1552_v20 = vpop.f32.mrb[3].mxu1 }
 0x285   : > { %781 = vst.msk [vmem:[%s2325_s26] sm:$0xff] %vm780_vm5, %v778_v10  ;;  %v779_v22 = vmax.f32 %v775_v14, 0.0  ;;  %838 = vrot.lane.b32.xlu0 %v835_v12, %s2026_s27  ;;  %v836_v24 = vmax.f32 %v832_v16, 0.0 }
 0x287   : > { %783 = vrot.lane.b32.xlu1 %v779_v22, %s2027_s10 }
 0x289   : > { %844 = vrot.lane.b32.xlu0 %v836_v24, %s2028_s8 }
 0x28c   : > { %v889_v25 = vpop.f32.mrb[4].mxu0  ;;  %v944_v26 = vpop.f32.mrb[4].mxu1 }
 0x28d   : > { %v890_v27 = vadd.f32 %v889_v25, %v2485_v0  ;;  %v945_v28 = vadd.f32 %v944_v26, %v2485_v0  ;;  %v1561_v29 = vpop.f32.mrb[5].mxu0  ;;  %v1571_v30 = vpop.f32.mrb[5].mxu1 }
 0x28e   : > { %v892_v31 = vpop.f32.mrb[6].mxu0  ;;  %v947_v32 = vpop.f32.mrb[6].mxu1 }
 0x28f   : > { %v896_v9 = vmax.f32 %v890_v27, 0.0  ;;  %v951_v17 = vmax.f32 %v945_v28, 0.0  ;;  %v893_v33 = vadd.f32 %v892_v31, %v2483_v63  ;;  %v1562_v34 = vpop.f32.mrb[7].mxu0  ;;  %v1572_v35 = vpop.f32.mrb[7].mxu1  ;;  %v948_v37 = vadd.f32 %v947_v32, %v2483_v63 }
 0x291   : > { %898 = vst.msk [vmem:[%s2325_s26 + $0x8] sm:$0xff] %vm780_vm5, %v896_v9  ;;  %v897_v36 = vmax.f32 %v893_v33, 0.0  ;;  %954 = vrot.lane.b32.xlu1 %v951_v17, %s2026_s27  ;;  %v952_v38 = vmax.f32 %v948_v37, 0.0 }
 0x295   : > { %900 = vrot.lane.b32.xlu1 %v897_v36, %s2027_s10 }
 0x298   : > { %v1003_v39 = vpop.f32.mrb[8].mxu0  ;;  %v1058_v11 = vpop.f32.mrb[8].mxu1 }
 0x299   : > { %v1004_v40 = vadd.f32 %v1003_v39, %v2485_v0  ;;  %v1059_v19 = vadd.f32 %v1058_v11, %v2485_v0  ;;  %v1591_v41 = vpop.f32.mrb[9].mxu1  ;;  %959 = vrot.lane.b32.xlu1 %v952_v38, %s2028_s8  ;;  %v1581_v42 = vpop.f32.mrb[9].mxu0 }
 0x29a   : > { %v1006_v43 = vpop.f32.mrb[10].mxu0  ;;  %v1061_v44 = vpop.f32.mrb[10].mxu1 }
 0x29b   : > { %v1010_v45 = vmax.f32 %v1004_v40, 0.0  ;;  %v1065_v46 = vmax.f32 %v1059_v19, 0.0  ;;  %v1007_v47 = vadd.f32 %v1006_v43, %v2483_v63  ;;  %v1582_v13 = vpop.f32.mrb[11].mxu0  ;;  %v1592_v21 = vpop.f32.mrb[11].mxu1  ;;  %v1062_v49 = vadd.f32 %v1061_v44, %v2483_v63 }
 0x29d   : > { %1012 = vst.msk [vmem:[%s2325_s26 + $0x10] sm:$0xff] %vm780_vm5, %v1010_v45  ;;  %1068 = vrot.lane.b32.xlu0 %v1065_v46, %s2026_s27  ;;  %v1011_v48 = vmax.f32 %v1007_v47, 0.0  ;;  %v1066_v50 = vmax.f32 %v1062_v49, 0.0 }
 0x2a1   : > { %1014 = vrot.lane.b32.xlu0 %v1011_v48, %s2027_s10 }
 0x2a4   : > { %v1117_v15 = vpop.f32.mrb[12].mxu0  ;;  %v1172_v23 = vpop.f32.mrb[12].mxu1 }
 0x2a5   : > { %v1118_v51 = vadd.f32 %v1117_v15, %v2485_v0  ;;  %v1173_v52 = vadd.f32 %v1172_v23, %v2485_v0  ;;  %v1611_v53 = vpop.f32.mrb[13].mxu1  ;;  %1073 = vrot.lane.b32.xlu0 %v1066_v50, %s2028_s8  ;;  %v1601_v54 = vpop.f32.mrb[13].mxu0 }
 0x2a6   : > { %v1120_v55 = vpop.f32.mrb[14].mxu0  ;;  %v1175_v56 = vpop.f32.mrb[14].mxu1 }
 0x2a7   : > { %v1124_v57 = vmax.f32 %v1118_v51, 0.0  ;;  %v1179_v58 = vmax.f32 %v1173_v52, 0.0  ;;  %v1121_v59 = vadd.f32 %v1120_v55, %v2483_v63  ;;  %v1602_v60 = vpop.f32.mrb[15].mxu0  ;;  %v1612_v61 = vpop.f32.mrb[15].mxu1  ;;  %v1176_v0 = vadd.f32 %v1175_v56, %v2483_v63 }
 0x2a9   : > { %1126 = vst.msk [vmem:[%s2325_s26 + $0x18] sm:$0xff] %vm780_vm5, %v1124_v57  ;;  %1182 = vrot.lane.b32.xlu1 %v1179_v58, %s2026_s27  ;;  %v1125_v62 = vmax.f32 %v1121_v59, 0.0  ;;  %v1180_v1 = vmax.f32 %v1176_v0, 0.0  ;;  %s2029_s27 = smov [#allocation11]  }
 0x2ad   : > { %1128 = vrot.lane.b32.xlu1 %v1125_v62, %s2027_s10  ;;  %s1886_s10 = sshll.u32 %s2029_s27, 4  ;;  %s1887_s10 = int_to_ptr.vmem [resolvable:$false] %s1886_s10 }
 0x2ae   : > { %p1889_p6 = scmp.lt.s32.totalorder %s2553_s14, %s1887_s10 }
 0x2b1   : > { %1187 = vrot.lane.b32.xlu1 %v1180_v1, %s2028_s8  ;;  %s1888_s8 = scalar_lea.vmem %s1887_s10, 1024 }
 0x2b2   : > { %p1890_p8 = scmp.lt.s32.totalorder %s1888_s8, %s1882_s30 }
 0x2b4   : > { %p1891_p12 = por %p1890_p8, %p1889_p6 }
 0x2b6   : > { %p1892_p4 = pnand %p1891_p12, %p1885_p13 }
 0x2f7   : > { %v839_v2 = vpop.permute.xlu0 %838 }
 0x2f9   : > { %v784_v3 = vpop.permute.xlu1 %783 }
 0x2fa   : > { %787 = vst.msk [vmem:[%s2325_s26] sm:$0xff] %vm786_vm6, %v784_v3 }
 0x2fb   : > { %v845_v4 = vpop.permute.xlu0 %844  ;;  %842 = vst.msk [vmem:[%s2325_s26] sm:$0xff] %vm841_vm7, %v839_v2 }
 0x2fc   : > { %848 = vst.msk [vmem:[%s2325_s26] sm:$0xff] %vm847_vm8, %v845_v4 }
 0x303   : > { %v955_v63 = vpop.permute.xlu1 %954 }
 0x307   : > { %v901_v5 = vpop.permute.xlu1 %900 }
 0x308   : > { %903 = vst.msk [vmem:[%s2325_s26 + $0x8] sm:$0xff] %vm786_vm6, %v901_v5 }
 0x309   : > { %957 = vst.msk [vmem:[%s2325_s26 + $0x8] sm:$0xff] %vm841_vm7, %v955_v63 }
 0x30b   : > { %v960_v6 = vpop.permute.xlu1 %959 }
 0x30c   : > { %962 = vst.msk [vmem:[%s2325_s26 + $0x8] sm:$0xff] %vm847_vm8, %v960_v6 }
 0x30f   : > { %v1069_v7 = vpop.permute.xlu0 %1068 }
 0x313   : > { %v1015_v8 = vpop.permute.xlu0 %1014 }
 0x314   : > { %1017 = vst.msk [vmem:[%s2325_s26 + $0x10] sm:$0xff] %vm786_vm6, %v1015_v8 }
 0x315   : > { %1071 = vst.msk [vmem:[%s2325_s26 + $0x10] sm:$0xff] %vm841_vm7, %v1069_v7 }
 0x317   : > { %v1074_v10 = vpop.permute.xlu0 %1073 }
 0x318   : > { %1076 = vst.msk [vmem:[%s2325_s26 + $0x10] sm:$0xff] %vm847_vm8, %v1074_v10 }
 0x31b   : > { %v1183_v12 = vpop.permute.xlu1 %1182 }
 0x31f   : > { %v1129_v14 = vpop.permute.xlu1 %1128 }
 0x320   : > { %1131 = vst.msk [vmem:[%s2325_s26 + $0x18] sm:$0xff] %vm786_vm6, %v1129_v14 }
 0x321   : > { %1185 = vst.msk [vmem:[%s2325_s26 + $0x18] sm:$0xff] %vm841_vm7, %v1183_v12 }
 0x323   : > { %v1188_v16 = vpop.permute.xlu1 %1187 }
 0x324   : > { %1190 = vst.msk [vmem:[%s2325_s26 + $0x18] sm:$0xff] %vm847_vm8, %v1188_v16 }
 0x325   : > { %1895 = shalt.err (!%p1892_p4)
}
 0x326   : > { %s1896_s2 = scalar_lea.hbm %s2551_s28, 512  ;;  %s1900_s6 = scalar_lea.hbm %s2660_s7, 2048 }
 0x327   : > { %p1897_p7 = scmp.ne.s32.totalorder %s2551_s28, %s1896_s2  ;;  %p1901_p1 = scmp.lt.u32.totalorder %s2551_s28, %s2660_s7 }
 0x328   : > { %p1902_p11 = scmp.lt.u32.totalorder %s1900_s6, %s1896_s2  ;;  %p1904_p2 = scmp.lt.u32.totalorder %s1896_s2, %s2551_s28 }
 0x329   : > { %p1898_p3 = pnand %p1897_p7, %p2661_p9 }
 0x32a   : > { %p1903_p10 = por %p1902_p11, %p1901_p1 }
 0x32b   : > { %p1899_p0 = pneg %p1898_p3 }
 0x32c   : > { %p1905_p5 = por %p1904_p2, %p1903_p10 }
 0x32e   : > { %p1906_p13 = pnand %p1905_p5, %p1899_p0 }
 0x330   : > { %1909 = shalt.err (!%p1906_p13)
}
 0x331   : > { %1629 = dma.vmem_to_hbm [thread:$0]  (%p2661_p9), %s2553_s14, 512, %s2551_s28, %s1192_s21  }
 0x332 PF: > { %s2662_s11 = sld [smem:[#allocation16_spill]]  ;;  %s2663_s13 = sld [smem:[#allocation19_spill]] }
 0x333   : > { %p1656_p6 = scmp.ge.s32.totalorder %s2012_s25, 2 }
 0x338   : > { %s1220_s29 = sand.u32 1, %s2662_s11   ;;  %p2664_p8 = scmp.ne.s32.totalorder %s2663_s13, 0 }
 0x339   : > { %s1221_s30 = scalar_lea.sflag [#allocation5], %s1220_s29 }
 0x33a   : > { %p1646_p12 = pnand %p1656_p6, %p2664_p8 }
 0x33c   : > { %1967 = dma.done.wait (!%p1646_p12), %s1221_s30, 512  }
 0x33d   : > { %1969 = vsyncadd (!%p1646_p12), %s1221_s30, 4294966784  ;;  %s22_s25 = sadd.s32 1, %s2012_s25   ;;  %s2665_s14 = smov %s2677_s22 }
 0x33e   : > { %p19_p4 = scmp.ge.s32.totalorder %s22_s25, 6   ;;  %s2666_s15 = smov %s1976_s16 }
 0x33f   : > { %s2667_s16 = smov %s1980_s17  ;;  %s2668_s17 = smov %s2259_s4 }
 0x340   : > { %s2669_s18 = smov %s1988_s19  ;;  %s2670_s19 = smov %s1992_s20 }
 0x341   : > { %s2671_s20 = smov %s2254_s12  ;;  %s2672_s21 = smov %s2004_s23 }
 0x342   : > { %s2673_s22 = smov %s2008_s24  ;;  %s2674_s23 = smov %s2665_s14 }
 0x343   : > { %s2675_s24 = smov %s2681_s5  ;;  %21 = sbr.rel (!%p19_p4) target bundleno = 15 (0xf), region = 109 }
 0x34a   :  { %1226 = vsyncpa [#allocation4], 1 }
 0x34b   :  { %1228 = vsyncpa [#allocation4 + $0x1], 1 }
 0x34c   :  { %1229 = vsyncpa [#allocation7], 1 }
 0x34d   :  { %1230 = vsyncpa [#allocation10], 1 }
 0x34e   :  { %1231 = vsyncpa [#allocation5], 1 }
 0x34f   :  { %1233 = vsyncpa [#allocation5 + $0x1], 1 }

</bundles_post_ra>
